<compile_context>
chip_gen: v5e
topology: v5e:2x2
jax: 0.10.0
libtpu: 0.0.40
codegen_flags: <defaults>
</compile_context>

<pallas_src>
import functools
import math

import jax
import jax.numpy as jnp
import numpy as np
from jax.experimental import pallas as pl
from jax.experimental.pallas import tpu as pltpu

LN_EPS = 1e-5
_INV_SQRT2 = 1.0 / math.sqrt(2.0)


def _round_up(n, m):
    return ((n + m - 1) // m) * m


def _layernorm_padded(x, w, b, inv_n):
    # x: (rows, Ep) f32 with lanes >= true E exactly zero; w, b: (1, Ep) zero-padded.
    # mean / E[x^2] use the TRUE feature count (inv_n = 1/E_true); padded lanes contribute 0.
    mean = jnp.sum(x, axis=-1, keepdims=True) * inv_n
    meansq = jnp.sum(x * x, axis=-1, keepdims=True) * inv_n
    var = meansq - mean * mean
    return (x - mean) * jax.lax.rsqrt(var + LN_EPS) * w + b


def _gelu_exact(x):
    # PyTorch nn.GELU() default = exact erf formulation (kept in f32; tanh-approx on EUP
    # is a v6e option but deviates slightly from torch).
    return 0.5 * x * (1.0 + jax.lax.erf(x * jnp.float32(_INV_SQRT2)))


def encoder_layer_kernel(
    x_ref,        # (Bb, S, Ep) f32   Bb padded sequences
    wqkv_t_ref,   # (Ep, 3Ep)   bf16  pre-transposed, per-head-padded packed in_proj weight
    wo_t_ref,     # (Ep, Ep)    bf16  pre-transposed out_proj weight (per-head-padded rows)
    w1_t_ref,     # (Ep, Hp)    bf16  pre-transposed FFN weight 1
    w2_t_ref,     # (Hp, Ep)    bf16  pre-transposed FFN weight 2
    pk_ref,       # (8, P)      f32   packed biases / LayerNorm params (row per param)
    o_ref,        # (Bb, S, Ep)
    oc_ref,       # (Bb*S, Ep)  bf16  scratch: per-head attention output concat buffer
    *, num_heads, e_true, d_true,
):
    Bb, S, Ep = x_ref.shape
    rows = Bb * S
    dp = Ep // num_heads
    Hp = w1_t_ref.shape[1]
    scale = jnp.float32(1.0 / math.sqrt(d_true))
    inv_e = jnp.float32(1.0 / e_true)

    # Packed small params: read as (1, X) 2-D tiles (plain broadcasts, no 1-D relayout).
    pk = pk_ref[...]
    b_qkv = pk[0:1, :3 * Ep]
    b_o = pk[1:2, :Ep]
    ln1w, ln1b = pk[2:3, :Ep], pk[3:4, :Ep]
    b_1 = pk[4:5, :Hp]
    b_2 = pk[5:6, :Ep]
    ln2w, ln2b = pk[6:7, :Ep], pk[7:8, :Ep]

    x = x_ref[...].reshape(rows, Ep).astype(jnp.float32)   # merge leading (Bb, S) dims
    x_b = x.astype(jnp.bfloat16)

    # ---- fused QKV projection: one (rows, Ep) x (Ep, 3Ep) MXU matmul, f32 accumulation ----
    qkv = jnp.dot(x_b, wqkv_t_ref[...], preferred_element_type=jnp.float32) + b_qkv

    # ---- per-sequence, per-head scaled dot-product attention ----
    # Head outputs land at static lane slices of the bf16 concat scratch; the output
    # projection is ONE full-depth matmul afterwards (no folded tiny-K matmuls).
    for b in range(Bb):
        r0 = b * S
        for h in range(num_heads):
            c0 = h * dp
            qh = qkv[r0:r0 + S, c0:c0 + dp].astype(jnp.bfloat16)
            kh = qkv[r0:r0 + S, Ep + c0:Ep + c0 + dp].astype(jnp.bfloat16)
            vh = qkv[r0:r0 + S, 2 * Ep + c0:2 * Ep + c0 + dp].astype(jnp.bfloat16)
            s = jax.lax.dot_general(qh, kh, (((1,), (1,)), ((), ())),
                                    preferred_element_type=jnp.float32) * scale   # (S, S)
            s = s - jnp.max(s, axis=-1, keepdims=True)
            p = jnp.exp(s)
            p = p * pl.reciprocal(jnp.sum(p, axis=-1, keepdims=True), approx=True)
            oh = jnp.dot(p.astype(jnp.bfloat16), vh,
                         preferred_element_type=jnp.float32)                       # (S, dp)
            oc_ref[r0:r0 + S, c0:c0 + dp] = oh.astype(jnp.bfloat16)

    # ---- single output projection: (rows, Ep) x (Ep, Ep), full K=Ep contraction ----
    attn = jnp.dot(oc_ref[...], wo_t_ref[...], preferred_element_type=jnp.float32) + b_o

    # ---- residual + LayerNorm 1  (dropout1 = identity in eval mode) ----
    x1 = _layernorm_padded(attn + x, ln1w, ln1b, inv_e)

    # ---- feed-forward: Linear -> GELU -> Linear  (inner dropout = identity) ----
    h1 = jnp.dot(x1.astype(jnp.bfloat16), w1_t_ref[...],
                 preferred_element_type=jnp.float32) + b_1
    h1 = _gelu_exact(h1)
    ff = jnp.dot(h1.astype(jnp.bfloat16), w2_t_ref[...],
                 preferred_element_type=jnp.float32) + b_2

    # ---- residual + LayerNorm 2  (dropout2 = identity in eval mode) ----
    x2 = _layernorm_padded(ff + x1, ln2w, ln2b, inv_e)
    o_ref[...] = x2.reshape(Bb, S, Ep).astype(o_ref.dtype)   # lane-dense (Ep % 128 == 0) store


def encoder_layer(x, params, *, num_heads):
    """x: (B, S, E) float32. Returns (B, S, E). Params are in PyTorch-native layout."""
    B, S, E = x.shape
    Hdim = params["w1"].shape[0]
    assert E % num_heads == 0
    d = E // num_heads
    cdt = jnp.bfloat16
    lane = 128

    # Per-head lane padding: d -> dp so Ep = num_heads*dp is a multiple of 128.
    step = lane // math.gcd(num_heads, lane)
    dp = _round_up(d, step)
    Ep = num_heads * dp
    Hp = _round_up(Hdim, lane)

    # Block-batch: fold sequences per grid step until bf16 sublane packing (~16 rows) fills.
    max_bb = min(B, max(1, -(-16 // S)))
    bb = 1
    for cand in range(max_bb, 0, -1):
        if B % cand == 0:
            bb = cand
            break
    rows = bb * S

    # ---------- host-side weight prep (zero-padded, per-head layout, pre-transposed) ----------
    wqkv = np.asarray(params["wqkv"], np.float32)            # (3E, E) rows = out dims
    bqkv = np.asarray(params["bqkv"], np.float32).reshape(-1)
    wqkv_t_p = np.zeros((Ep, 3 * Ep), np.float32)
    bqkv_p = np.zeros((3 * Ep,), np.float32)
    for blk in range(3):                                     # q, k, v blocks
        w_blk = wqkv[blk * E:(blk + 1) * E]                  # (E, E)
        b_blk = bqkv[blk * E:(blk + 1) * E]
        for h in range(num_heads):
            c0 = blk * Ep + h * dp
            wqkv_t_p[:E, c0:c0 + d] = w_blk[h * d:(h + 1) * d, :].T
            bqkv_p[c0:c0 + d] = b_blk[h * d:(h + 1) * d]

    wo = np.asarray(params["wo"], np.float32)                # (E, E) rows = out dims
    wo_t_p = np.zeros((Ep, Ep), np.float32)
    for h in range(num_heads):
        wo_t_p[h * dp:h * dp + d, :E] = wo[:, h * d:(h + 1) * d].T
    bo_p = np.zeros((Ep,), np.float32)
    bo_p[:E] = np.asarray(params["bo"], np.float32).reshape(-1)

    w1 = np.asarray(params["w1"], np.float32)                # (Hdim, E)
    w1_t_p = np.zeros((Ep, Hp), np.float32)
    w1_t_p[:E, :Hdim] = w1.T
    b1_p = np.zeros((Hp,), np.float32)
    b1_p[:Hdim] = np.asarray(params["b1"], np.float32).reshape(-1)

    w2 = np.asarray(params["w2"], np.float32)                # (E, Hdim)
    w2_t_p = np.zeros((Hp, Ep), np.float32)
    w2_t_p[:Hdim, :E] = w2.T
    b2_p = np.zeros((Ep,), np.float32)
    b2_p[:E] = np.asarray(params["b2"], np.float32).reshape(-1)

    def pad_e(v):
        out = np.zeros((Ep,), np.float32)
        out[:E] = np.asarray(v, np.float32).reshape(-1)
        return out

    ln1w_p, ln1b_p = pad_e(params["ln1w"]), pad_e(params["ln1b"])
    ln2w_p, ln2b_p = pad_e(params["ln2w"]), pad_e(params["ln2b"])

    # Pack all small 1-D params into one (8, P) f32 tile -> single input / DMA.
    P = max(3 * Ep, Hp)

    def row(v):
        out = np.zeros((P,), np.float32)
        out[:v.shape[0]] = v
        return out

    packed = jnp.asarray(np.stack([row(bqkv_p), row(bo_p), row(ln1w_p), row(ln1b_p),
                                   row(b1_p), row(b2_p), row(ln2w_p), row(ln2b_p)]))  # (8, P)

    wqkv_t = jnp.asarray(wqkv_t_p, cdt)
    wo_t = jnp.asarray(wo_t_p, cdt)
    w1_t = jnp.asarray(w1_t_p, cdt)
    w2_t = jnp.asarray(w2_t_p, cdt)
    weights = [wqkv_t, wo_t, w1_t, w2_t, packed]

    # Zero-pad activations to the lane-dense width.
    x_p = jnp.pad(x, ((0, 0), (0, 0), (0, Ep - E))) if Ep > E else x

    def full_spec(arr):
        nd = arr.ndim
        # TODO(synk): on v7x mark these grid-invariant weights pipeline_mode=pl.Buffered(1)
        # to halve weight VMEM residency at real model sizes.
        return pl.BlockSpec(arr.shape, lambda g, _nd=nd: (0,) * _nd)

    in_specs = [pl.BlockSpec((bb, S, Ep), lambda g: (g, 0, 0))] + [full_spec(w) for w in weights]
    out_spec = pl.BlockSpec((bb, S, Ep), lambda g: (g, 0, 0))

    # Advisory cost estimate for XLA scheduling around the custom call.
    rows_total = B * S
    flops = (2 * rows_total * Ep * (3 * Ep)                 # fused QKV
             + 4 * B * num_heads * S * S * dp               # scores + p@v
             + 2 * rows_total * Ep * Ep                     # output projection
             + 4 * rows_total * Ep * Hp)                    # FFN (both matmuls)
    transcendentals = B * num_heads * S * (S + 1) + rows_total * Hp + 4 * rows_total
    bytes_accessed = (2 * rows_total * Ep * 4               # activations in + out (f32)
                      + (Ep * 3 * Ep + Ep * Ep + 2 * Ep * Hp) * 2   # bf16 weights
                      + 8 * P * 4)                          # packed small params

    kernel = functools.partial(encoder_layer_kernel,
                               num_heads=num_heads, e_true=E, d_true=d)
    out_p = pl.pallas_call(
        kernel,
        out_shape=jax.ShapeDtypeStruct((B, S, Ep), x.dtype),
        grid_spec=pltpu.PrefetchScalarGridSpec(
            num_scalar_prefetch=0,
            grid=(B // bb,),
            in_specs=in_specs,
            out_specs=out_spec,
            scratch_shapes=[pltpu.VMEM((rows, Ep), jnp.bfloat16)],   # head-concat buffer
        ),
        # TODO(synk): add a second "parallel" row-tile grid axis (v7x dual-TC) and
        # flash-style S-tiling of qkv/x1/h1 for large S.
        compiler_params=pltpu.CompilerParams(
            dimension_semantics=("parallel",),
            vmem_limit_bytes=32 * 1024 * 1024),
        cost_estimate=pl.CostEstimate(
            flops=int(flops),
            transcendentals=int(transcendentals),
            bytes_accessed=int(bytes_accessed)),
    )(x_p, *weights)

    return out_p[..., :E]


def encoder_layer_ref(x, params, *, num_heads):
    """Pure-JAX f32 reference replicating the PyTorch forward (eval mode)."""
    B, S, E = x.shape
    d = E // num_heads
    wqkv, bqkv = params["wqkv"], params["bqkv"][0]
    q = x @ wqkv[:E].T + bqkv[:E]
    k = x @ wqkv[E:2 * E].T + bqkv[E:2 * E]
    v = x @ wqkv[2 * E:].T + bqkv[2 * E:]

    def split(t):  # (B,S,E) -> (B,H,S,d)
        return t.reshape(B, S, num_heads, d).transpose(0, 2, 1, 3)

    qh, kh, vh = split(q), split(k), split(v)
    s = jnp.einsum("bhqd,bhkd->bhqk", qh, kh) / math.sqrt(d)
    p = jax.nn.softmax(s, axis=-1)
    o = jnp.einsum("bhqk,bhkd->bhqd", p, vh).transpose(0, 2, 1, 3).reshape(B, S, E)
    attn = o @ params["wo"].T + params["bo"][0]

    def ln(t, w, b):
        m = t.mean(-1, keepdims=True)
        var = ((t - m) ** 2).mean(-1, keepdims=True)
        return (t - m) / jnp.sqrt(var + LN_EPS) * w[0] + b[0]

    x1 = ln(attn + x, params["ln1w"], params["ln1b"])
    h = x1 @ params["w1"].T + params["b1"][0]
    h = 0.5 * h * (1.0 + jax.lax.erf(h / math.sqrt(2.0)))
    ff = h @ params["w2"].T + params["b2"][0]
    return ln(ff + x1, params["ln2w"], params["ln2b"])


def init_params(key, embed_size, num_heads, expend):
    E, H = embed_size, embed_size * expend
    ks = jax.random.split(key, 6)
    std = 0.05
    return {
        "wqkv": std * jax.random.normal(ks[0], (3 * E, E), jnp.float32),
        "bqkv": std * jax.random.normal(ks[1], (1, 3 * E), jnp.float32),
        "wo":   std * jax.random.normal(ks[2], (E, E), jnp.float32),
        "bo":   jnp.zeros((1, E), jnp.float32),
        "ln1w": jnp.ones((1, E), jnp.float32),
        "ln1b": jnp.zeros((1, E), jnp.float32),
        "w1":   std * jax.random.normal(ks[3], (H, E), jnp.float32),
        "b1":   std * jax.random.normal(ks[4], (1, H), jnp.float32),
        "w2":   std * jax.random.normal(ks[5], (E, H), jnp.float32),
        "b2":   jnp.zeros((1, E), jnp.float32),
        "ln2w": jnp.ones((1, E), jnp.float32),
        "ln2b": jnp.zeros((1, E), jnp.float32),
    }


if __name__ == "__main__":
    # Small shapes consistent with the module: a batch of patch-embedding sequences.
    B, S, E = 2, 8, 32          # embed_size = 32 (scaled down from 786)
    NUM_HEADS = 4               # E % NUM_HEADS == 0
    EXPEND = 4

    key = jax.random.PRNGKey(0)
    kx, kp = jax.random.split(key)
    x = jax.random.normal(kx, (B, S, E), jnp.float32)
    params = init_params(kp, E, NUM_HEADS, EXPEND)

    out = encoder_layer(x, params, num_heads=NUM_HEADS)
    out = jax.block_until_ready(out)

    # f32 reference vs bf16-matmul kernel: tolerance sized for bf16 inputs / f32 accumulation.
    ref = encoder_layer_ref(x, params, num_heads=NUM_HEADS)
    np.testing.assert_allclose(np.asarray(out), np.asarray(ref), rtol=2e-2, atol=2e-2)

    print("KERNEL_OK")
</pallas_src>

<mosaic_0001>
module attributes {stable_mosaic.version = 11 : i64} {
  func.func @encoder_layer_kernel(%arg0: i32, %arg1: memref<2x8x128xf32, #tpu.memory_space<vmem>>, %arg2: memref<128x384xbf16, #tpu.memory_space<vmem>>, %arg3: memref<128x128xbf16, #tpu.memory_space<vmem>>, %arg4: memref<128x128xbf16, #tpu.memory_space<vmem>>, %arg5: memref<128x128xbf16, #tpu.memory_space<vmem>>, %arg6: memref<8x384xf32, #tpu.memory_space<vmem>>, %arg7: memref<2x8x128xf32, #tpu.memory_space<vmem>>, %arg8: memref<16x128xbf16, #tpu.memory_space<vmem>>) attributes {dimension_semantics = [#tpu.dimension_semantics<parallel>], iteration_bounds = array<i64: 1>, scalar_prefetch = 0 : i64, scratch_operands = 1 : i64, tpu.core_type = #tpu.core_type<tc>, window_params = [{transform_indices = @transform_0, window_bounds = array<i64: 2, 8, 128>}, {pipeline_mode = #tpu.pipeline_mode<synchronous>, transform_indices = @transform_1, window_bounds = array<i64: 128, 384>}, {pipeline_mode = #tpu.pipeline_mode<synchronous>, transform_indices = @transform_2, window_bounds = array<i64: 128, 128>}, {pipeline_mode = #tpu.pipeline_mode<synchronous>, transform_indices = @transform_3, window_bounds = array<i64: 128, 128>}, {pipeline_mode = #tpu.pipeline_mode<synchronous>, transform_indices = @transform_4, window_bounds = array<i64: 128, 128>}, {pipeline_mode = #tpu.pipeline_mode<synchronous>, transform_indices = @transform_5, window_bounds = array<i64: 8, 384>}, {transform_indices = @transform_6, window_bounds = array<i64: 2, 8, 128>}]} {
    %c0 = arith.constant 0 : index
    %c0_0 = arith.constant 0 : index
    %0 = vector.load %arg6[%c0, %c0_0] : memref<8x384xf32, #tpu.memory_space<vmem>>, vector<8x384xf32>
    %1 = vector.extract_strided_slice %0 {offsets = [0, 0], sizes = [1, 384], strides = [1, 1]} : vector<8x384xf32> to vector<1x384xf32>
    %2 = vector.extract_strided_slice %0 {offsets = [1, 0], sizes = [1, 128], strides = [1, 1]} : vector<8x384xf32> to vector<1x128xf32>
    %3 = vector.extract_strided_slice %0 {offsets = [2, 0], sizes = [1, 128], strides = [1, 1]} : vector<8x384xf32> to vector<1x128xf32>
    %4 = vector.extract_strided_slice %0 {offsets = [3, 0], sizes = [1, 128], strides = [1, 1]} : vector<8x384xf32> to vector<1x128xf32>
    %5 = vector.extract_strided_slice %0 {offsets = [4, 0], sizes = [1, 128], strides = [1, 1]} : vector<8x384xf32> to vector<1x128xf32>
    %6 = vector.extract_strided_slice %0 {offsets = [5, 0], sizes = [1, 128], strides = [1, 1]} : vector<8x384xf32> to vector<1x128xf32>
    %7 = vector.extract_strided_slice %0 {offsets = [6, 0], sizes = [1, 128], strides = [1, 1]} : vector<8x384xf32> to vector<1x128xf32>
    %8 = vector.extract_strided_slice %0 {offsets = [7, 0], sizes = [1, 128], strides = [1, 1]} : vector<8x384xf32> to vector<1x128xf32>
    %c0_1 = arith.constant 0 : index
    %c0_2 = arith.constant 0 : index
    %c0_3 = arith.constant 0 : index
    %9 = vector.load %arg1[%c0_1, %c0_2, %c0_3] : memref<2x8x128xf32, #tpu.memory_space<vmem>>, vector<2x8x128xf32>
    %10 = vector.shape_cast %9 : vector<2x8x128xf32> to vector<16x128xf32>
    %11 = arith.truncf %10 : vector<16x128xf32> to vector<16x128xbf16>
    %c0_4 = arith.constant 0 : index
    %c0_5 = arith.constant 0 : index
    %12 = vector.load %arg2[%c0_4, %c0_5] : memref<128x384xbf16, #tpu.memory_space<vmem>>, vector<128x384xbf16>
    %cst = arith.constant dense<0.000000e+00> : vector<16x384xf32>
    %13 = tpu.matmul %11, %12, %cst {dimension_numbers = #tpu.dot_dimension_numbers<[1], [0], [0], [1], [0, 0, 1, 1], [], []>} : vector<16x128xbf16>, vector<128x384xbf16>, vector<16x384xf32> -> vector<16x384xf32>
    %14 = vector.broadcast %1 : vector<1x384xf32> to vector<16x384xf32>
    %15 = arith.addf %13, %14 : vector<16x384xf32>
    %16 = vector.extract_strided_slice %15 {offsets = [0, 0], sizes = [8, 32], strides = [1, 1]} : vector<16x384xf32> to vector<8x32xf32>
    %17 = arith.truncf %16 : vector<8x32xf32> to vector<8x32xbf16>
    %18 = vector.extract_strided_slice %15 {offsets = [0, 128], sizes = [8, 32], strides = [1, 1]} : vector<16x384xf32> to vector<8x32xf32>
    %19 = arith.truncf %18 : vector<8x32xf32> to vector<8x32xbf16>
    %20 = vector.extract_strided_slice %15 {offsets = [0, 256], sizes = [8, 32], strides = [1, 1]} : vector<16x384xf32> to vector<8x32xf32>
    %21 = arith.truncf %20 : vector<8x32xf32> to vector<8x32xbf16>
    %cst_6 = arith.constant dense<0.000000e+00> : vector<8x8xf32>
    %22 = tpu.matmul %17, %19, %cst_6 {dimension_numbers = #tpu.dot_dimension_numbers<[1], [1], [0], [0], [0, 0, 1, 0], [], []>} : vector<8x32xbf16>, vector<8x32xbf16>, vector<8x8xf32> -> vector<8x8xf32>
    %cst_7 = arith.constant 0.353553385 : f32
    %23 = vector.broadcast %cst_7 : f32 to vector<8x8xf32>
    %24 = arith.mulf %22, %23 : vector<8x8xf32>
    %cst_8 = arith.constant dense<0xFF800000> : vector<8xf32>
    %25 = vector.multi_reduction <maximumf>, %24, %cst_8 [1] : vector<8x8xf32> to vector<8xf32>
    %26 = vector.shape_cast %25 : vector<8xf32> to vector<8x1xf32>
    %27 = vector.broadcast %26 : vector<8x1xf32> to vector<8x8xf32>
    %28 = arith.subf %24, %27 : vector<8x8xf32>
    %29 = math.exp %28 : vector<8x8xf32>
    %cst_9 = arith.constant dense<0.000000e+00> : vector<8xf32>
    %30 = vector.multi_reduction <add>, %29, %cst_9 [1] : vector<8x8xf32> to vector<8xf32>
    %31 = vector.shape_cast %30 : vector<8xf32> to vector<8x1xf32>
    %32 = tpu.reciprocal %31 {approx = true} : vector<8x1xf32> -> vector<8x1xf32>
    %33 = vector.broadcast %32 : vector<8x1xf32> to vector<8x8xf32>
    %34 = arith.mulf %29, %33 : vector<8x8xf32>
    %35 = arith.truncf %34 : vector<8x8xf32> to vector<8x8xbf16>
    %cst_10 = arith.constant dense<0.000000e+00> : vector<8x32xf32>
    %36 = tpu.matmul %35, %21, %cst_10 {dimension_numbers = #tpu.dot_dimension_numbers<[1], [0], [0], [1], [0, 0, 1, 1], [], []>} : vector<8x8xbf16>, vector<8x32xbf16>, vector<8x32xf32> -> vector<8x32xf32>
    %37 = arith.truncf %36 : vector<8x32xf32> to vector<8x32xbf16>
    %c0_11 = arith.constant 0 : index
    %c0_12 = arith.constant 0 : index
    %38 = vector.load %arg8[%c0_11, %c0_12] : memref<16x128xbf16, #tpu.memory_space<vmem>>, vector<8x32xbf16>
    tpu.vector_store %arg8[%c0_11, %c0_12], %37 {strides = array<i32>} : memref<16x128xbf16, #tpu.memory_space<vmem>>, vector<8x32xbf16>,
    %39 = vector.extract_strided_slice %15 {offsets = [0, 32], sizes = [8, 32], strides = [1, 1]} : vector<16x384xf32> to vector<8x32xf32>
    %40 = arith.truncf %39 : vector<8x32xf32> to vector<8x32xbf16>
    %41 = vector.extract_strided_slice %15 {offsets = [0, 160], sizes = [8, 32], strides = [1, 1]} : vector<16x384xf32> to vector<8x32xf32>
    %42 = arith.truncf %41 : vector<8x32xf32> to vector<8x32xbf16>
    %43 = vector.extract_strided_slice %15 {offsets = [0, 288], sizes = [8, 32], strides = [1, 1]} : vector<16x384xf32> to vector<8x32xf32>
    %44 = arith.truncf %43 : vector<8x32xf32> to vector<8x32xbf16>
    %cst_13 = arith.constant dense<0.000000e+00> : vector<8x8xf32>
    %45 = tpu.matmul %40, %42, %cst_13 {dimension_numbers = #tpu.dot_dimension_numbers<[1], [1], [0], [0], [0, 0, 1, 0], [], []>} : vector<8x32xbf16>, vector<8x32xbf16>, vector<8x8xf32> -> vector<8x8xf32>
    %cst_14 = arith.constant 0.353553385 : f32
    %46 = vector.broadcast %cst_14 : f32 to vector<8x8xf32>
    %47 = arith.mulf %45, %46 : vector<8x8xf32>
    %cst_15 = arith.constant dense<0xFF800000> : vector<8xf32>
    %48 = vector.multi_reduction <maximumf>, %47, %cst_15 [1] : vector<8x8xf32> to vector<8xf32>
    %49 = vector.shape_cast %48 : vector<8xf32> to vector<8x1xf32>
    %50 = vector.broadcast %49 : vector<8x1xf32> to vector<8x8xf32>
    %51 = arith.subf %47, %50 : vector<8x8xf32>
    %52 = math.exp %51 : vector<8x8xf32>
    %cst_16 = arith.constant dense<0.000000e+00> : vector<8xf32>
    %53 = vector.multi_reduction <add>, %52, %cst_16 [1] : vector<8x8xf32> to vector<8xf32>
    %54 = vector.shape_cast %53 : vector<8xf32> to vector<8x1xf32>
    %55 = tpu.reciprocal %54 {approx = true} : vector<8x1xf32> -> vector<8x1xf32>
    %56 = vector.broadcast %55 : vector<8x1xf32> to vector<8x8xf32>
    %57 = arith.mulf %52, %56 : vector<8x8xf32>
    %58 = arith.truncf %57 : vector<8x8xf32> to vector<8x8xbf16>
    %cst_17 = arith.constant dense<0.000000e+00> : vector<8x32xf32>
    %59 = tpu.matmul %58, %44, %cst_17 {dimension_numbers = #tpu.dot_dimension_numbers<[1], [0], [0], [1], [0, 0, 1, 1], [], []>} : vector<8x8xbf16>, vector<8x32xbf16>, vector<8x32xf32> -> vector<8x32xf32>
    %60 = arith.truncf %59 : vector<8x32xf32> to vector<8x32xbf16>
    %c0_18 = arith.constant 0 : index
    %c32 = arith.constant 32 : index
    %61 = vector.load %arg8[%c0_18, %c32] : memref<16x128xbf16, #tpu.memory_space<vmem>>, vector<8x32xbf16>
    tpu.vector_store %arg8[%c0_18, %c32], %60 {strides = array<i32>} : memref<16x128xbf16, #tpu.memory_space<vmem>>, vector<8x32xbf16>,
    %62 = vector.extract_strided_slice %15 {offsets = [0, 64], sizes = [8, 32], strides = [1, 1]} : vector<16x384xf32> to vector<8x32xf32>
    %63 = arith.truncf %62 : vector<8x32xf32> to vector<8x32xbf16>
    %64 = vector.extract_strided_slice %15 {offsets = [0, 192], sizes = [8, 32], strides = [1, 1]} : vector<16x384xf32> to vector<8x32xf32>
    %65 = arith.truncf %64 : vector<8x32xf32> to vector<8x32xbf16>
    %66 = vector.extract_strided_slice %15 {offsets = [0, 320], sizes = [8, 32], strides = [1, 1]} : vector<16x384xf32> to vector<8x32xf32>
    %67 = arith.truncf %66 : vector<8x32xf32> to vector<8x32xbf16>
    %cst_19 = arith.constant dense<0.000000e+00> : vector<8x8xf32>
    %68 = tpu.matmul %63, %65, %cst_19 {dimension_numbers = #tpu.dot_dimension_numbers<[1], [1], [0], [0], [0, 0, 1, 0], [], []>} : vector<8x32xbf16>, vector<8x32xbf16>, vector<8x8xf32> -> vector<8x8xf32>
    %cst_20 = arith.constant 0.353553385 : f32
    %69 = vector.broadcast %cst_20 : f32 to vector<8x8xf32>
    %70 = arith.mulf %68, %69 : vector<8x8xf32>
    %cst_21 = arith.constant dense<0xFF800000> : vector<8xf32>
    %71 = vector.multi_reduction <maximumf>, %70, %cst_21 [1] : vector<8x8xf32> to vector<8xf32>
    %72 = vector.shape_cast %71 : vector<8xf32> to vector<8x1xf32>
    %73 = vector.broadcast %72 : vector<8x1xf32> to vector<8x8xf32>
    %74 = arith.subf %70, %73 : vector<8x8xf32>
    %75 = math.exp %74 : vector<8x8xf32>
    %cst_22 = arith.constant dense<0.000000e+00> : vector<8xf32>
    %76 = vector.multi_reduction <add>, %75, %cst_22 [1] : vector<8x8xf32> to vector<8xf32>
    %77 = vector.shape_cast %76 : vector<8xf32> to vector<8x1xf32>
    %78 = tpu.reciprocal %77 {approx = true} : vector<8x1xf32> -> vector<8x1xf32>
    %79 = vector.broadcast %78 : vector<8x1xf32> to vector<8x8xf32>
    %80 = arith.mulf %75, %79 : vector<8x8xf32>
    %81 = arith.truncf %80 : vector<8x8xf32> to vector<8x8xbf16>
    %cst_23 = arith.constant dense<0.000000e+00> : vector<8x32xf32>
    %82 = tpu.matmul %81, %67, %cst_23 {dimension_numbers = #tpu.dot_dimension_numbers<[1], [0], [0], [1], [0, 0, 1, 1], [], []>} : vector<8x8xbf16>, vector<8x32xbf16>, vector<8x32xf32> -> vector<8x32xf32>
    %83 = arith.truncf %82 : vector<8x32xf32> to vector<8x32xbf16>
    %c0_24 = arith.constant 0 : index
    %c64 = arith.constant 64 : index
    %84 = vector.load %arg8[%c0_24, %c64] : memref<16x128xbf16, #tpu.memory_space<vmem>>, vector<8x32xbf16>
    tpu.vector_store %arg8[%c0_24, %c64], %83 {strides = array<i32>} : memref<16x128xbf16, #tpu.memory_space<vmem>>, vector<8x32xbf16>,
    %85 = vector.extract_strided_slice %15 {offsets = [0, 96], sizes = [8, 32], strides = [1, 1]} : vector<16x384xf32> to vector<8x32xf32>
    %86 = arith.truncf %85 : vector<8x32xf32> to vector<8x32xbf16>
    %87 = vector.extract_strided_slice %15 {offsets = [0, 224], sizes = [8, 32], strides = [1, 1]} : vector<16x384xf32> to vector<8x32xf32>
    %88 = arith.truncf %87 : vector<8x32xf32> to vector<8x32xbf16>
    %89 = vector.extract_strided_slice %15 {offsets = [0, 352], sizes = [8, 32], strides = [1, 1]} : vector<16x384xf32> to vector<8x32xf32>
    %90 = arith.truncf %89 : vector<8x32xf32> to vector<8x32xbf16>
    %cst_25 = arith.constant dense<0.000000e+00> : vector<8x8xf32>
    %91 = tpu.matmul %86, %88, %cst_25 {dimension_numbers = #tpu.dot_dimension_numbers<[1], [1], [0], [0], [0, 0, 1, 0], [], []>} : vector<8x32xbf16>, vector<8x32xbf16>, vector<8x8xf32> -> vector<8x8xf32>
    %cst_26 = arith.constant 0.353553385 : f32
    %92 = vector.broadcast %cst_26 : f32 to vector<8x8xf32>
    %93 = arith.mulf %91, %92 : vector<8x8xf32>
    %cst_27 = arith.constant dense<0xFF800000> : vector<8xf32>
    %94 = vector.multi_reduction <maximumf>, %93, %cst_27 [1] : vector<8x8xf32> to vector<8xf32>
    %95 = vector.shape_cast %94 : vector<8xf32> to vector<8x1xf32>
    %96 = vector.broadcast %95 : vector<8x1xf32> to vector<8x8xf32>
    %97 = arith.subf %93, %96 : vector<8x8xf32>
    %98 = math.exp %97 : vector<8x8xf32>
    %cst_28 = arith.constant dense<0.000000e+00> : vector<8xf32>
    %99 = vector.multi_reduction <add>, %98, %cst_28 [1] : vector<8x8xf32> to vector<8xf32>
    %100 = vector.shape_cast %99 : vector<8xf32> to vector<8x1xf32>
    %101 = tpu.reciprocal %100 {approx = true} : vector<8x1xf32> -> vector<8x1xf32>
    %102 = vector.broadcast %101 : vector<8x1xf32> to vector<8x8xf32>
    %103 = arith.mulf %98, %102 : vector<8x8xf32>
    %104 = arith.truncf %103 : vector<8x8xf32> to vector<8x8xbf16>
    %cst_29 = arith.constant dense<0.000000e+00> : vector<8x32xf32>
    %105 = tpu.matmul %104, %90, %cst_29 {dimension_numbers = #tpu.dot_dimension_numbers<[1], [0], [0], [1], [0, 0, 1, 1], [], []>} : vector<8x8xbf16>, vector<8x32xbf16>, vector<8x32xf32> -> vector<8x32xf32>
    %106 = arith.truncf %105 : vector<8x32xf32> to vector<8x32xbf16>
    %c0_30 = arith.constant 0 : index
    %c96 = arith.constant 96 : index
    %107 = vector.load %arg8[%c0_30, %c96] : memref<16x128xbf16, #tpu.memory_space<vmem>>, vector<8x32xbf16>
    tpu.vector_store %arg8[%c0_30, %c96], %106 {strides = array<i32>} : memref<16x128xbf16, #tpu.memory_space<vmem>>, vector<8x32xbf16>,
    %108 = vector.extract_strided_slice %15 {offsets = [8, 0], sizes = [8, 32], strides = [1, 1]} : vector<16x384xf32> to vector<8x32xf32>
    %109 = arith.truncf %108 : vector<8x32xf32> to vector<8x32xbf16>
    %110 = vector.extract_strided_slice %15 {offsets = [8, 128], sizes = [8, 32], strides = [1, 1]} : vector<16x384xf32> to vector<8x32xf32>
    %111 = arith.truncf %110 : vector<8x32xf32> to vector<8x32xbf16>
    %112 = vector.extract_strided_slice %15 {offsets = [8, 256], sizes = [8, 32], strides = [1, 1]} : vector<16x384xf32> to vector<8x32xf32>
    %113 = arith.truncf %112 : vector<8x32xf32> to vector<8x32xbf16>
    %cst_31 = arith.constant dense<0.000000e+00> : vector<8x8xf32>
    %114 = tpu.matmul %109, %111, %cst_31 {dimension_numbers = #tpu.dot_dimension_numbers<[1], [1], [0], [0], [0, 0, 1, 0], [], []>} : vector<8x32xbf16>, vector<8x32xbf16>, vector<8x8xf32> -> vector<8x8xf32>
    %cst_32 = arith.constant 0.353553385 : f32
    %115 = vector.broadcast %cst_32 : f32 to vector<8x8xf32>
    %116 = arith.mulf %114, %115 : vector<8x8xf32>
    %cst_33 = arith.constant dense<0xFF800000> : vector<8xf32>
    %117 = vector.multi_reduction <maximumf>, %116, %cst_33 [1] : vector<8x8xf32> to vector<8xf32>
    %118 = vector.shape_cast %117 : vector<8xf32> to vector<8x1xf32>
    %119 = vector.broadcast %118 : vector<8x1xf32> to vector<8x8xf32>
    %120 = arith.subf %116, %119 : vector<8x8xf32>
    %121 = math.exp %120 : vector<8x8xf32>
    %cst_34 = arith.constant dense<0.000000e+00> : vector<8xf32>
    %122 = vector.multi_reduction <add>, %121, %cst_34 [1] : vector<8x8xf32> to vector<8xf32>
    %123 = vector.shape_cast %122 : vector<8xf32> to vector<8x1xf32>
    %124 = tpu.reciprocal %123 {approx = true} : vector<8x1xf32> -> vector<8x1xf32>
    %125 = vector.broadcast %124 : vector<8x1xf32> to vector<8x8xf32>
    %126 = arith.mulf %121, %125 : vector<8x8xf32>
    %127 = arith.truncf %126 : vector<8x8xf32> to vector<8x8xbf16>
    %cst_35 = arith.constant dense<0.000000e+00> : vector<8x32xf32>
    %128 = tpu.matmul %127, %113, %cst_35 {dimension_numbers = #tpu.dot_dimension_numbers<[1], [0], [0], [1], [0, 0, 1, 1], [], []>} : vector<8x8xbf16>, vector<8x32xbf16>, vector<8x32xf32> -> vector<8x32xf32>
    %129 = arith.truncf %128 : vector<8x32xf32> to vector<8x32xbf16>
    %c8 = arith.constant 8 : index
    %c0_36 = arith.constant 0 : index
    %130 = vector.load %arg8[%c8, %c0_36] : memref<16x128xbf16, #tpu.memory_space<vmem>>, vector<8x32xbf16>
    tpu.vector_store %arg8[%c8, %c0_36], %129 {strides = array<i32>} : memref<16x128xbf16, #tpu.memory_space<vmem>>, vector<8x32xbf16>,
    %131 = vector.extract_strided_slice %15 {offsets = [8, 32], sizes = [8, 32], strides = [1, 1]} : vector<16x384xf32> to vector<8x32xf32>
    %132 = arith.truncf %131 : vector<8x32xf32> to vector<8x32xbf16>
    %133 = vector.extract_strided_slice %15 {offsets = [8, 160], sizes = [8, 32], strides = [1, 1]} : vector<16x384xf32> to vector<8x32xf32>
    %134 = arith.truncf %133 : vector<8x32xf32> to vector<8x32xbf16>
    %135 = vector.extract_strided_slice %15 {offsets = [8, 288], sizes = [8, 32], strides = [1, 1]} : vector<16x384xf32> to vector<8x32xf32>
    %136 = arith.truncf %135 : vector<8x32xf32> to vector<8x32xbf16>
    %cst_37 = arith.constant dense<0.000000e+00> : vector<8x8xf32>
    %137 = tpu.matmul %132, %134, %cst_37 {dimension_numbers = #tpu.dot_dimension_numbers<[1], [1], [0], [0], [0, 0, 1, 0], [], []>} : vector<8x32xbf16>, vector<8x32xbf16>, vector<8x8xf32> -> vector<8x8xf32>
    %cst_38 = arith.constant 0.353553385 : f32
    %138 = vector.broadcast %cst_38 : f32 to vector<8x8xf32>
    %139 = arith.mulf %137, %138 : vector<8x8xf32>
    %cst_39 = arith.constant dense<0xFF800000> : vector<8xf32>
    %140 = vector.multi_reduction <maximumf>, %139, %cst_39 [1] : vector<8x8xf32> to vector<8xf32>
    %141 = vector.shape_cast %140 : vector<8xf32> to vector<8x1xf32>
    %142 = vector.broadcast %141 : vector<8x1xf32> to vector<8x8xf32>
    %143 = arith.subf %139, %142 : vector<8x8xf32>
    %144 = math.exp %143 : vector<8x8xf32>
    %cst_40 = arith.constant dense<0.000000e+00> : vector<8xf32>
    %145 = vector.multi_reduction <add>, %144, %cst_40 [1] : vector<8x8xf32> to vector<8xf32>
    %146 = vector.shape_cast %145 : vector<8xf32> to vector<8x1xf32>
    %147 = tpu.reciprocal %146 {approx = true} : vector<8x1xf32> -> vector<8x1xf32>
    %148 = vector.broadcast %147 : vector<8x1xf32> to vector<8x8xf32>
    %149 = arith.mulf %144, %148 : vector<8x8xf32>
    %150 = arith.truncf %149 : vector<8x8xf32> to vector<8x8xbf16>
    %cst_41 = arith.constant dense<0.000000e+00> : vector<8x32xf32>
    %151 = tpu.matmul %150, %136, %cst_41 {dimension_numbers = #tpu.dot_dimension_numbers<[1], [0], [0], [1], [0, 0, 1, 1], [], []>} : vector<8x8xbf16>, vector<8x32xbf16>, vector<8x32xf32> -> vector<8x32xf32>
    %152 = arith.truncf %151 : vector<8x32xf32> to vector<8x32xbf16>
    %c8_42 = arith.constant 8 : index
    %c32_43 = arith.constant 32 : index
    %153 = vector.load %arg8[%c8_42, %c32_43] : memref<16x128xbf16, #tpu.memory_space<vmem>>, vector<8x32xbf16>
    tpu.vector_store %arg8[%c8_42, %c32_43], %152 {strides = array<i32>} : memref<16x128xbf16, #tpu.memory_space<vmem>>, vector<8x32xbf16>,
    %154 = vector.extract_strided_slice %15 {offsets = [8, 64], sizes = [8, 32], strides = [1, 1]} : vector<16x384xf32> to vector<8x32xf32>
    %155 = arith.truncf %154 : vector<8x32xf32> to vector<8x32xbf16>
    %156 = vector.extract_strided_slice %15 {offsets = [8, 192], sizes = [8, 32], strides = [1, 1]} : vector<16x384xf32> to vector<8x32xf32>
    %157 = arith.truncf %156 : vector<8x32xf32> to vector<8x32xbf16>
    %158 = vector.extract_strided_slice %15 {offsets = [8, 320], sizes = [8, 32], strides = [1, 1]} : vector<16x384xf32> to vector<8x32xf32>
    %159 = arith.truncf %158 : vector<8x32xf32> to vector<8x32xbf16>
    %cst_44 = arith.constant dense<0.000000e+00> : vector<8x8xf32>
    %160 = tpu.matmul %155, %157, %cst_44 {dimension_numbers = #tpu.dot_dimension_numbers<[1], [1], [0], [0], [0, 0, 1, 0], [], []>} : vector<8x32xbf16>, vector<8x32xbf16>, vector<8x8xf32> -> vector<8x8xf32>
    %cst_45 = arith.constant 0.353553385 : f32
    %161 = vector.broadcast %cst_45 : f32 to vector<8x8xf32>
    %162 = arith.mulf %160, %161 : vector<8x8xf32>
    %cst_46 = arith.constant dense<0xFF800000> : vector<8xf32>
    %163 = vector.multi_reduction <maximumf>, %162, %cst_46 [1] : vector<8x8xf32> to vector<8xf32>
    %164 = vector.shape_cast %163 : vector<8xf32> to vector<8x1xf32>
    %165 = vector.broadcast %164 : vector<8x1xf32> to vector<8x8xf32>
    %166 = arith.subf %162, %165 : vector<8x8xf32>
    %167 = math.exp %166 : vector<8x8xf32>
    %cst_47 = arith.constant dense<0.000000e+00> : vector<8xf32>
    %168 = vector.multi_reduction <add>, %167, %cst_47 [1] : vector<8x8xf32> to vector<8xf32>
    %169 = vector.shape_cast %168 : vector<8xf32> to vector<8x1xf32>
    %170 = tpu.reciprocal %169 {approx = true} : vector<8x1xf32> -> vector<8x1xf32>
    %171 = vector.broadcast %170 : vector<8x1xf32> to vector<8x8xf32>
    %172 = arith.mulf %167, %171 : vector<8x8xf32>
    %173 = arith.truncf %172 : vector<8x8xf32> to vector<8x8xbf16>
    %cst_48 = arith.constant dense<0.000000e+00> : vector<8x32xf32>
    %174 = tpu.matmul %173, %159, %cst_48 {dimension_numbers = #tpu.dot_dimension_numbers<[1], [0], [0], [1], [0, 0, 1, 1], [], []>} : vector<8x8xbf16>, vector<8x32xbf16>, vector<8x32xf32> -> vector<8x32xf32>
    %175 = arith.truncf %174 : vector<8x32xf32> to vector<8x32xbf16>
    %c8_49 = arith.constant 8 : index
    %c64_50 = arith.constant 64 : index
    %176 = vector.load %arg8[%c8_49, %c64_50] : memref<16x128xbf16, #tpu.memory_space<vmem>>, vector<8x32xbf16>
    tpu.vector_store %arg8[%c8_49, %c64_50], %175 {strides = array<i32>} : memref<16x128xbf16, #tpu.memory_space<vmem>>, vector<8x32xbf16>,
    %177 = vector.extract_strided_slice %15 {offsets = [8, 96], sizes = [8, 32], strides = [1, 1]} : vector<16x384xf32> to vector<8x32xf32>
    %178 = arith.truncf %177 : vector<8x32xf32> to vector<8x32xbf16>
    %179 = vector.extract_strided_slice %15 {offsets = [8, 224], sizes = [8, 32], strides = [1, 1]} : vector<16x384xf32> to vector<8x32xf32>
    %180 = arith.truncf %179 : vector<8x32xf32> to vector<8x32xbf16>
    %181 = vector.extract_strided_slice %15 {offsets = [8, 352], sizes = [8, 32], strides = [1, 1]} : vector<16x384xf32> to vector<8x32xf32>
    %182 = arith.truncf %181 : vector<8x32xf32> to vector<8x32xbf16>
    %cst_51 = arith.constant dense<0.000000e+00> : vector<8x8xf32>
    %183 = tpu.matmul %178, %180, %cst_51 {dimension_numbers = #tpu.dot_dimension_numbers<[1], [1], [0], [0], [0, 0, 1, 0], [], []>} : vector<8x32xbf16>, vector<8x32xbf16>, vector<8x8xf32> -> vector<8x8xf32>
    %cst_52 = arith.constant 0.353553385 : f32
    %184 = vector.broadcast %cst_52 : f32 to vector<8x8xf32>
    %185 = arith.mulf %183, %184 : vector<8x8xf32>
    %cst_53 = arith.constant dense<0xFF800000> : vector<8xf32>
    %186 = vector.multi_reduction <maximumf>, %185, %cst_53 [1] : vector<8x8xf32> to vector<8xf32>
    %187 = vector.shape_cast %186 : vector<8xf32> to vector<8x1xf32>
    %188 = vector.broadcast %187 : vector<8x1xf32> to vector<8x8xf32>
    %189 = arith.subf %185, %188 : vector<8x8xf32>
    %190 = math.exp %189 : vector<8x8xf32>
    %cst_54 = arith.constant dense<0.000000e+00> : vector<8xf32>
    %191 = vector.multi_reduction <add>, %190, %cst_54 [1] : vector<8x8xf32> to vector<8xf32>
    %192 = vector.shape_cast %191 : vector<8xf32> to vector<8x1xf32>
    %193 = tpu.reciprocal %192 {approx = true} : vector<8x1xf32> -> vector<8x1xf32>
    %194 = vector.broadcast %193 : vector<8x1xf32> to vector<8x8xf32>
    %195 = arith.mulf %190, %194 : vector<8x8xf32>
    %196 = arith.truncf %195 : vector<8x8xf32> to vector<8x8xbf16>
    %cst_55 = arith.constant dense<0.000000e+00> : vector<8x32xf32>
    %197 = tpu.matmul %196, %182, %cst_55 {dimension_numbers = #tpu.dot_dimension_numbers<[1], [0], [0], [1], [0, 0, 1, 1], [], []>} : vector<8x8xbf16>, vector<8x32xbf16>, vector<8x32xf32> -> vector<8x32xf32>
    %198 = arith.truncf %197 : vector<8x32xf32> to vector<8x32xbf16>
    %c8_56 = arith.constant 8 : index
    %c96_57 = arith.constant 96 : index
    %199 = vector.load %arg8[%c8_56, %c96_57] : memref<16x128xbf16, #tpu.memory_space<vmem>>, vector<8x32xbf16>
    tpu.vector_store %arg8[%c8_56, %c96_57], %198 {strides = array<i32>} : memref<16x128xbf16, #tpu.memory_space<vmem>>, vector<8x32xbf16>,
    %c0_58 = arith.constant 0 : index
    %c0_59 = arith.constant 0 : index
    %200 = vector.load %arg8[%c0_58, %c0_59] : memref<16x128xbf16, #tpu.memory_space<vmem>>, vector<16x128xbf16>
    %c0_60 = arith.constant 0 : index
    %c0_61 = arith.constant 0 : index
    %201 = vector.load %arg3[%c0_60, %c0_61] : memref<128x128xbf16, #tpu.memory_space<vmem>>, vector<128x128xbf16>
    %cst_62 = arith.constant dense<0.000000e+00> : vector<16x128xf32>
    %202 = tpu.matmul %200, %201, %cst_62 {dimension_numbers = #tpu.dot_dimension_numbers<[1], [0], [0], [1], [0, 0, 1, 1], [], []>} : vector<16x128xbf16>, vector<128x128xbf16>, vector<16x128xf32> -> vector<16x128xf32>
    %203 = vector.broadcast %2 : vector<1x128xf32> to vector<16x128xf32>
    %204 = arith.addf %202, %203 : vector<16x128xf32>
    %205 = arith.addf %204, %10 : vector<16x128xf32>
    %cst_63 = arith.constant dense<0.000000e+00> : vector<16xf32>
    %206 = vector.multi_reduction <add>, %205, %cst_63 [1] : vector<16x128xf32> to vector<16xf32>
    %207 = vector.shape_cast %206 : vector<16xf32> to vector<16x1xf32>
    %cst_64 = arith.constant 3.125000e-02 : f32
    %208 = vector.broadcast %cst_64 : f32 to vector<16x1xf32>
    %209 = arith.mulf %207, %208 : vector<16x1xf32>
    %210 = arith.mulf %205, %205 : vector<16x128xf32>
    %cst_65 = arith.constant dense<0.000000e+00> : vector<16xf32>
    %211 = vector.multi_reduction <add>, %210, %cst_65 [1] : vector<16x128xf32> to vector<16xf32>
    %212 = vector.shape_cast %211 : vector<16xf32> to vector<16x1xf32>
    %cst_66 = arith.constant 3.125000e-02 : f32
    %213 = vector.broadcast %cst_66 : f32 to vector<16x1xf32>
    %214 = arith.mulf %212, %213 : vector<16x1xf32>
    %215 = arith.mulf %209, %209 : vector<16x1xf32>
    %216 = arith.subf %214, %215 : vector<16x1xf32>
    %217 = vector.broadcast %209 : vector<16x1xf32> to vector<16x128xf32>
    %218 = arith.subf %205, %217 : vector<16x128xf32>
    %cst_67 = arith.constant 9.99999974E-6 : f32
    %219 = vector.broadcast %cst_67 : f32 to vector<16x1xf32>
    %220 = arith.addf %216, %219 : vector<16x1xf32>
    %221 = math.rsqrt %220 : vector<16x1xf32>
    %222 = vector.broadcast %221 : vector<16x1xf32> to vector<16x128xf32>
    %223 = arith.mulf %218, %222 : vector<16x128xf32>
    %224 = vector.broadcast %3 : vector<1x128xf32> to vector<16x128xf32>
    %225 = arith.mulf %223, %224 : vector<16x128xf32>
    %226 = vector.broadcast %4 : vector<1x128xf32> to vector<16x128xf32>
    %227 = arith.addf %225, %226 : vector<16x128xf32>
    %228 = arith.truncf %227 : vector<16x128xf32> to vector<16x128xbf16>
    %c0_68 = arith.constant 0 : index
    %c0_69 = arith.constant 0 : index
    %229 = vector.load %arg4[%c0_68, %c0_69] : memref<128x128xbf16, #tpu.memory_space<vmem>>, vector<128x128xbf16>
    %cst_70 = arith.constant dense<0.000000e+00> : vector<16x128xf32>
    %230 = tpu.matmul %228, %229, %cst_70 {dimension_numbers = #tpu.dot_dimension_numbers<[1], [0], [0], [1], [0, 0, 1, 1], [], []>} : vector<16x128xbf16>, vector<128x128xbf16>, vector<16x128xf32> -> vector<16x128xf32>
    %231 = vector.broadcast %5 : vector<1x128xf32> to vector<16x128xf32>
    %232 = arith.addf %230, %231 : vector<16x128xf32>
    %cst_71 = arith.constant 5.000000e-01 : f32
    %233 = vector.broadcast %cst_71 : f32 to vector<16x128xf32>
    %234 = arith.mulf %233, %232 : vector<16x128xf32>
    %cst_72 = arith.constant 0.707106769 : f32
    %235 = vector.broadcast %cst_72 : f32 to vector<16x128xf32>
    %236 = arith.mulf %232, %235 : vector<16x128xf32>
    %237 = math.erf %236 : vector<16x128xf32>
    %cst_73 = arith.constant 1.000000e+00 : f32
    %238 = vector.broadcast %cst_73 : f32 to vector<16x128xf32>
    %239 = arith.addf %238, %237 : vector<16x128xf32>
    %240 = arith.mulf %234, %239 : vector<16x128xf32>
    %241 = arith.truncf %240 : vector<16x128xf32> to vector<16x128xbf16>
    %c0_74 = arith.constant 0 : index
    %c0_75 = arith.constant 0 : index
    %242 = vector.load %arg5[%c0_74, %c0_75] : memref<128x128xbf16, #tpu.memory_space<vmem>>, vector<128x128xbf16>
    %cst_76 = arith.constant dense<0.000000e+00> : vector<16x128xf32>
    %243 = tpu.matmul %241, %242, %cst_76 {dimension_numbers = #tpu.dot_dimension_numbers<[1], [0], [0], [1], [0, 0, 1, 1], [], []>} : vector<16x128xbf16>, vector<128x128xbf16>, vector<16x128xf32> -> vector<16x128xf32>
    %244 = vector.broadcast %6 : vector<1x128xf32> to vector<16x128xf32>
    %245 = arith.addf %243, %244 : vector<16x128xf32>
    %246 = arith.addf %245, %227 : vector<16x128xf32>
    %cst_77 = arith.constant dense<0.000000e+00> : vector<16xf32>
    %247 = vector.multi_reduction <add>, %246, %cst_77 [1] : vector<16x128xf32> to vector<16xf32>
    %248 = vector.shape_cast %247 : vector<16xf32> to vector<16x1xf32>
    %cst_78 = arith.constant 3.125000e-02 : f32
    %249 = vector.broadcast %cst_78 : f32 to vector<16x1xf32>
    %250 = arith.mulf %248, %249 : vector<16x1xf32>
    %251 = arith.mulf %246, %246 : vector<16x128xf32>
    %cst_79 = arith.constant dense<0.000000e+00> : vector<16xf32>
    %252 = vector.multi_reduction <add>, %251, %cst_79 [1] : vector<16x128xf32> to vector<16xf32>
    %253 = vector.shape_cast %252 : vector<16xf32> to vector<16x1xf32>
    %cst_80 = arith.constant 3.125000e-02 : f32
    %254 = vector.broadcast %cst_80 : f32 to vector<16x1xf32>
    %255 = arith.mulf %253, %254 : vector<16x1xf32>
    %256 = arith.mulf %250, %250 : vector<16x1xf32>
    %257 = arith.subf %255, %256 : vector<16x1xf32>
    %258 = vector.broadcast %250 : vector<16x1xf32> to vector<16x128xf32>
    %259 = arith.subf %246, %258 : vector<16x128xf32>
    %cst_81 = arith.constant 9.99999974E-6 : f32
    %260 = vector.broadcast %cst_81 : f32 to vector<16x1xf32>
    %261 = arith.addf %257, %260 : vector<16x1xf32>
    %262 = math.rsqrt %261 : vector<16x1xf32>
    %263 = vector.broadcast %262 : vector<16x1xf32> to vector<16x128xf32>
    %264 = arith.mulf %259, %263 : vector<16x128xf32>
    %265 = vector.broadcast %7 : vector<1x128xf32> to vector<16x128xf32>
    %266 = arith.mulf %264, %265 : vector<16x128xf32>
    %267 = vector.broadcast %8 : vector<1x128xf32> to vector<16x128xf32>
    %268 = arith.addf %266, %267 : vector<16x128xf32>
    %269 = vector.shape_cast %268 : vector<16x128xf32> to vector<2x8x128xf32>
    %c0_82 = arith.constant 0 : index
    %c0_83 = arith.constant 0 : index
    %c0_84 = arith.constant 0 : index
    %270 = vector.load %arg7[%c0_82, %c0_83, %c0_84] : memref<2x8x128xf32, #tpu.memory_space<vmem>>, vector<2x8x128xf32>
    tpu.vector_store %arg7[%c0_82, %c0_83, %c0_84], %269 {strides = array<i32>} : memref<2x8x128xf32, #tpu.memory_space<vmem>>, vector<2x8x128xf32>,
    return
  }
  func.func @transform_0(%arg0: i32) -> (i32, i32, i32) {
    %c0_i32 = arith.constant 0 : i32
    %c0_i32_0 = arith.constant 0 : i32
    %c0_i32_1 = arith.constant 0 : i32
    return %arg0, %c0_i32, %c0_i32_0 : i32, i32, i32
  }
  func.func @transform_1(%arg0: i32) -> (i32, i32) {
    %c0_i32 = arith.constant 0 : i32
    %c0_i32_0 = arith.constant 0 : i32
    %c0_i32_1 = arith.constant 0 : i32
    return %c0_i32, %c0_i32_0 : i32, i32
  }
  func.func @transform_2(%arg0: i32) -> (i32, i32) {
    %c0_i32 = arith.constant 0 : i32
    %c0_i32_0 = arith.constant 0 : i32
    %c0_i32_1 = arith.constant 0 : i32
    return %c0_i32, %c0_i32_0 : i32, i32
  }
  func.func @transform_3(%arg0: i32) -> (i32, i32) {
    %c0_i32 = arith.constant 0 : i32
    %c0_i32_0 = arith.constant 0 : i32
    %c0_i32_1 = arith.constant 0 : i32
    return %c0_i32, %c0_i32_0 : i32, i32
  }
  func.func @transform_4(%arg0: i32) -> (i32, i32) {
    %c0_i32 = arith.constant 0 : i32
    %c0_i32_0 = arith.constant 0 : i32
    %c0_i32_1 = arith.constant 0 : i32
    return %c0_i32, %c0_i32_0 : i32, i32
  }
  func.func @transform_5(%arg0: i32) -> (i32, i32) {
    %c0_i32 = arith.constant 0 : i32
    %c0_i32_0 = arith.constant 0 : i32
    %c0_i32_1 = arith.constant 0 : i32
    return %c0_i32, %c0_i32_0 : i32, i32
  }
  func.func @transform_6(%arg0: i32) -> (i32, i32, i32) {
    %c0_i32 = arith.constant 0 : i32
    %c0_i32_0 = arith.constant 0 : i32
    %c0_i32_1 = arith.constant 0 : i32
    return %arg0, %c0_i32, %c0_i32_0 : i32, i32, i32
  }
}

</mosaic_0001>

<bundles_post_ra>
// kernel: tpu_custom_call.1
= control target key start
LH: loop header
LB: loop body
LE: loop exit
PB: predicated region body
PF: predicated region fallthrough
CT: control target
= control target key end

     0   :  { %11 = vsyncpa [#allocation4], 0  ;;  %s2023_s0 = inlined_call_operand.hbm [shape: f32[2,8,128], index: 0, kind: input, shape index: {}]   ;;  %s2024_s1 = inlined_call_operand.hbm [shape: bf16[128,384], index: 1, kind: input, shape index: {}]   ;;  %s2025_s2 = inlined_call_operand.hbm [shape: bf16[128,128], index: 2, kind: input, shape index: {}]   ;;  %s2026_s3 = inlined_call_operand.hbm [shape: bf16[128,128], index: 3, kind: input, shape index: {}]   ;;  %s2027_s4 = inlined_call_operand.hbm [shape: bf16[128,128], index: 4, kind: input, shape index: {}]   ;;  %s2028_s5 = inlined_call_operand.hbm [shape: f32[8,384], index: 5, kind: input, shape index: {}]   ;;  %s2029_s6 = inlined_call_operand.hbm [shape: f32[2,8,128], index: 6, kind: output, shape index: {}]  }
   0x1   :  { %12 = vsyncpa [#allocation7], 0 }
   0x2   :  { %13 = vsyncpa [#allocation10], 0 }
   0x3   :  { %14 = vsyncpa [#allocation13], 0  ;;  %s33_s23 = sshll.u32 %s2024_s1, 4  ;;  %s34_s23 = int_to_ptr.hbm [resolvable:$true] %s33_s23 }
   0x4   :  { %15 = vsyncpa [#allocation5], 0  ;;  %s1795_s24 = smov [#allocation6]   ;;  %s1796_s26 = smov 192  }
   0x5   :  { %s35_s25 = sshll.u32 %s1795_s24, 4  ;;  %s1797_s27 = smov 12   ;;  %s36_s25 = int_to_ptr.vmem [resolvable:$true] %s35_s25 }
   0x6   :  { %41 = dma.hbm_to_vmem [thread:$0]  %s34_s23, 3072, %s36_s25, [#allocation7], %s1796_s26, %s1796_s26, %s1797_s27  }
   0x7   :  { %s59_s30 = sshll.u32 %s2026_s3, 4  ;;  %s1798_s7 = smov [#allocation9]   ;;  %s60_s30 = int_to_ptr.hbm [resolvable:$true] %s59_s30 }
   0x8   :  { %s61_s8 = sshll.u32 %s1798_s7, 4  ;;  %s20_s11 = sshll.u32 %s2023_s0, 4  ;;  %s62_s8 = int_to_ptr.vmem [resolvable:$true] %s61_s8  ;;  %s21_s11 = int_to_ptr.hbm [resolvable:$true] %s20_s11 }
   0x9   :  { %s1799_s1 = smov 64   ;;  %s1800_s12 = smov 4  }
   0xa   :  { %67 = dma.hbm_to_vmem [thread:$0]  %s60_s30, 1024, %s62_s8, [#allocation10], %s1799_s1, %s1799_s1, %s1800_s12  }
   0xb   :  { %s1801_s13 = smov [#allocation3]   ;;  %s46_s3 = sshll.u32 %s2025_s2, 4  ;;  %s47_s3 = int_to_ptr.hbm [resolvable:$true] %s46_s3 }
   0xc   :  { %s22_s14 = sshll.u32 %s1801_s13, 4  ;;  %s1802_s17 = smov 128   ;;  %s23_s14 = int_to_ptr.vmem [resolvable:$true] %s22_s14 }
   0xd   :  { %s1803_s18 = smov 8   ;;  %s1804_s0 = smov [#allocation8]  }
   0xe   :  { %28 = dma.hbm_to_vmem [thread:$0]  %s21_s11, 256, %s23_s14, [#allocation4], %s1802_s17, %s1802_s17, %s1803_s18  }
   0xf   :  { %s48_s19 = sshll.u32 %s1804_s0, 4  ;;  %s72_s22 = sshll.u32 %s2027_s4, 4  ;;  %s49_s19 = int_to_ptr.vmem [resolvable:$true] %s48_s19  ;;  %s73_s22 = int_to_ptr.hbm [resolvable:$true] %s72_s22 }
  0x10   :  { %54 = dma.hbm_to_vmem [thread:$0]  %s47_s3, 1024, %s49_s19, [#allocation7], %s1799_s1, %s1799_s1, %s1800_s12  }
  0x11   :  { %s86_s24 = sshll.u32 %s2028_s5, 4  ;;  %s1805_s25 = smov [#allocation11]   ;;  %s87_s24 = int_to_ptr.hbm [resolvable:$true] %s86_s24 }
  0x12   :  { %s74_s26 = sshll.u32 %s1805_s25, 4  ;;  %s1806_s27 = smov [#allocation12]   ;;  %s75_s26 = int_to_ptr.vmem [resolvable:$true] %s74_s26 }
  0x13   :  { %80 = dma.hbm_to_vmem [thread:$0]  %s73_s22, 1024, %s75_s26, [#allocation10], %s1799_s1, %s1799_s1, %s1800_s12  }
  0x14   :  { %s88_s28 = sshll.u32 %s1806_s27, 4  ;;  %s89_s28 = int_to_ptr.vmem [resolvable:$true] %s88_s28 }
  0x15   :  { %91 = dma.hbm_to_vmem [thread:$0]  %s87_s24, 384, %s89_s28, [#allocation13]  }
  0x16   :  { %1785 = dma.done.wait [#allocation4], 256  }
  0x17   :  { %1786 = vsyncadd [#allocation4], 4294967040 }
  0x18   :  { %1787 = dma.done.wait [#allocation7], 4096  }
  0x19   :  { %1788 = vsyncadd [#allocation7], 4294963200 }
  0x1a   :  { %1789 = dma.done.wait [#allocation10], 2048  }
  0x1b   :  { %1790 = vsyncadd [#allocation10], 4294965248 }
  0x1c   :  { %1791 = dma.done.wait [#allocation13], 384  }
  0x1d   :  { %1792 = vsyncadd [#allocation13], 4294966912  ;;  %v1380_v0 = vld [vmem:[#allocation6 + $0xa8] sm:$0xf]  ;;  %v1530_v1 = vld [vmem:[#allocation6 + $0xb0] sm:$0xf0] }
  0x1e   :  { %v1529_v2 = vld [vmem:[#allocation6 + $0xac] sm:$0xf]  ;;  %v1381_v3 = vor.u32 %v1530_v1, %v1380_v0  ;;  %v1382_v4 = vld [vmem:[#allocation6 + $0xb4] sm:$0xf0]  ;;  %v1368_v5 = vld [vmem:[#allocation6 + $0x90] sm:$0xf] }
  0x1f   :  { %v1527_v6 = vld [vmem:[#allocation6 + $0x98] sm:$0xf0]  ;;  %v1385_v7 = vor.u32 %v1529_v2, %v1382_v4  ;;  %v1526_v8 = vld [vmem:[#allocation6 + $0x94] sm:$0xf]  ;;  %v1370_v9 = vld [vmem:[#allocation6 + $0x9c] sm:$0xf0] }
  0x20   :  { %286 = vmatpush.bf16.msra.mxu0 %v1381_v3  ;;  %v1369_v10 = vor.u32 %v1527_v6, %v1368_v5  ;;  %v1373_v11 = vor.u32 %v1526_v8, %v1370_v9  ;;  %v1356_v12 = vld [vmem:[#allocation6 + $0x78] sm:$0xf]  ;;  %v1524_v13 = vld [vmem:[#allocation6 + $0x80] sm:$0xf0]  ;;  %v1523_v14 = vld [vmem:[#allocation6 + $0x7c] sm:$0xf] }
  0x21   :  { %300 = vmatpush.bf16.msra.mxu1 %v1385_v7  ;;  %v1358_v15 = vld [vmem:[#allocation6 + $0x84] sm:$0xf0]  ;;  %v1357_v16 = vor.u32 %v1524_v13, %v1356_v12  ;;  %v1344_v18 = vld [vmem:[#allocation6 + $0x60] sm:$0xf]  ;;  %v1521_v19 = vld [vmem:[#allocation6 + $0x68] sm:$0xf0] }
  0x22   :  { %v1361_v17 = vor.u32 %v1523_v14, %v1358_v15  ;;  %v1520_v20 = vld [vmem:[#allocation6 + $0x64] sm:$0xf]  ;;  %v1346_v21 = vld [vmem:[#allocation6 + $0x6c] sm:$0xf0]  ;;  %v1345_v22 = vor.u32 %v1521_v19, %v1344_v18  ;;  %v1332_v23 = vld [vmem:[#allocation6 + $0x48] sm:$0xf] }
  0x23   :  { %v1388_v24 = vld [vmem:[#allocation6 + $0xb0] sm:$0xf]  ;;  %v1531_v25 = vld [vmem:[#allocation6 + $0xb8] sm:$0xf0]  ;;  %v1349_v26 = vor.u32 %v1520_v20, %v1346_v21  ;;  %v1518_v27 = vld [vmem:[#allocation6 + $0x50] sm:$0xf0] }
  0x24   :  { %287 = vmatpush.bf16.msra.mxu0 %v1369_v10  ;;  %v1389_v28 = vor.u32 %v1531_v25, %v1388_v24  ;;  %v1376_v29 = vld [vmem:[#allocation6 + $0x98] sm:$0xf]  ;;  %v1528_v30 = vld [vmem:[#allocation6 + $0xa0] sm:$0xf0]  ;;  %v1517_v31 = vld [vmem:[#allocation6 + $0x4c] sm:$0xf]  ;;  %v1333_v34 = vor.u32 %v1518_v27, %v1332_v23 }
  0x25   :  { %301 = vmatpush.bf16.msra.mxu1 %v1373_v11  ;;  %v1334_v32 = vld [vmem:[#allocation6 + $0x54] sm:$0xf0]  ;;  %v1377_v33 = vor.u32 %v1528_v30, %v1376_v29  ;;  %v1364_v35 = vld [vmem:[#allocation6 + $0x80] sm:$0xf]  ;;  %v1525_v36 = vld [vmem:[#allocation6 + $0x88] sm:$0xf0] }
  0x26   :  { %314 = vmatpush.bf16.msra.mxu2 %v1389_v28  ;;  %v1337_v37 = vor.u32 %v1517_v31, %v1334_v32  ;;  %v1320_v38 = vld [vmem:[#allocation6 + $0x30] sm:$0xf]  ;;  %v1515_v39 = vld [vmem:[#allocation6 + $0x38] sm:$0xf0]  ;;  %v1514_v40 = vld [vmem:[#allocation6 + $0x34] sm:$0xf]  ;;  %v1365_v42 = vor.u32 %v1525_v36, %v1364_v35 }
  0x27   :  { %v1322_v41 = vld [vmem:[#allocation6 + $0x3c] sm:$0xf0]  ;;  %v1321_v43 = vor.u32 %v1515_v39, %v1320_v38  ;;  %v1352_v44 = vld [vmem:[#allocation6 + $0x68] sm:$0xf]  ;;  %v1522_v45 = vld [vmem:[#allocation6 + $0x70] sm:$0xf0] }
  0x28   :  { %288 = vmatpush.bf16.msra.mxu0 %v1357_v16  ;;  %v1325_v46 = vor.u32 %v1514_v40, %v1322_v41  ;;  %v1308_v47 = vld [vmem:[#allocation6 + $0x18] sm:$0xf]  ;;  %v1512_v48 = vld [vmem:[#allocation6 + $0x20] sm:$0xf0]  ;;  %v1511_v49 = vld [vmem:[#allocation6 + $0x1c] sm:$0xf]  ;;  %v1353_v51 = vor.u32 %v1522_v45, %v1352_v44 }
  0x29   :  { %302 = vmatpush.bf16.msra.mxu1 %v1361_v17  ;;  %v1310_v50 = vld [vmem:[#allocation6 + $0x24] sm:$0xf0]  ;;  %v1309_v52 = vor.u32 %v1512_v48, %v1308_v47  ;;  %v1340_v53 = vld [vmem:[#allocation6 + $0x50] sm:$0xf]  ;;  %v1519_v54 = vld [vmem:[#allocation6 + $0x58] sm:$0xf0] }
  0x2a   :  { %315 = vmatpush.bf16.msra.mxu2 %v1377_v33  ;;  %v1313_v55 = vor.u32 %v1511_v49, %v1310_v50  ;;  %v1296_v56 = vld [vmem:[#allocation6] sm:$0xf]  ;;  %v1509_v57 = vld [vmem:[#allocation6 + $0x8] sm:$0xf0]  ;;  %v1508_v58 = vld [vmem:[#allocation6 + $0x4] sm:$0xf]  ;;  %v1341_v61 = vor.u32 %v1519_v54, %v1340_v53 }
  0x2b   :  { %v1298_v59 = vld [vmem:[#allocation6 + $0xc] sm:$0xf0]  ;;  %v1297_v62 = vor.u32 %v1509_v57, %v1296_v56  ;;  %v1874_v63 = vld [vmem:[#allocation3 + $0x8] sm:$0xff]  ;;  %v1516_v1 = vld [vmem:[#allocation6 + $0x40] sm:$0xf0]  ;;  %vm331_vm0 = vcmask 261120  }
  0x2c   :  { %289 = vmatpush.bf16.msra.mxu0 %v1345_v22  ;;  %v1872_v60 = vld [vmem:[#allocation3] sm:$0xff]  ;;  %v1328_v0 = vld [vmem:[#allocation6 + $0x38] sm:$0xf]  ;;  %v1301_v2 = vor.u32 %v1508_v58, %v1298_v59  ;;  %v1316_v5 = vld [vmem:[#allocation6 + $0x20] sm:$0xf]  ;;  %s1807_s4 = smov 96  }
  0x2d   :  { %303 = vmatpush.bf16.msra.mxu1 %v1349_v26  ;;  %v122_v3 = vpack.c.bf16 %v1874_v63, %v1872_v60  ;;  %v1329_v4 = vor.u32 %v1516_v1, %v1328_v0  ;;  %v1513_v6 = vld [vmem:[#allocation6 + $0x28] sm:$0xf0]  ;;  %v1304_v8 = vld [vmem:[#allocation6 + $0x8] sm:$0xf]  ;;  %v1510_v9 = vld [vmem:[#allocation6 + $0x10] sm:$0xf0] }
  0x2e   :  { %316 = vmatpush.bf16.msra.mxu2 %v1365_v42  ;;  %v1317_v7 = vor.u32 %v1513_v6, %v1316_v5  ;;  %v1305_v10 = vor.u32 %v1510_v9, %v1304_v8  ;;  %v118_v11 = vld [vmem:[#allocation12 + $0x8] sm:$0xff]  ;;  %v1878_v13 = vld [vmem:[#allocation12] sm:$0xff]  ;;  %s1808_s5 = smov 32   ;;  %v1893_v28 = vld [vmem:[#allocation12 + $0x10] sm:$0xff]  ;;  %vm368_vm1 = vcmask 1043456   ;;  %vm352_vm2 = vcmask 64512  }
  0x2f   :  { %v156_v12 = vperm.slane %v118_v11, 0  ;;  %v155_v15 = vperm.slane %v1878_v13, 0  ;;  %v157_v30 = vperm.slane %v1893_v28, 0  ;;  %vm386_vm3 = vcmask 257024   ;;  %s1809_s29 = smov [#allocation14]   ;;  %s1278_s9 = sshll.u32 %s2029_s6, 4  ;;  %s1279_s9 = int_to_ptr.hbm [resolvable:$true] %s1278_s9 }
  0x30   :  { %290 = vmatpush.bf16.msra.mxu0 %v1333_v34  ;;  %vm453_vm4 = vcmask 519424   ;;  %vm517_vm5 = vcmask 781824   ;;  %vm581_vm6 = vcmask 1044224   ;;  %s1276_s30 = sshll.u32 %s1809_s29, 4  ;;  %s1277_s30 = int_to_ptr.vmem [resolvable:$true] %s1276_s30 }
  0x31   :  { %304 = vmatpush.bf16.msra.mxu1 %v1337_v37 }
  0x32   :  { %317 = vmatpush.bf16.msra.mxu2 %v1353_v51 }
  0x34   :  { %291 = vmatpush.bf16.msra.mxu0 %v1321_v43 }
  0x35   :  { %305 = vmatpush.bf16.msra.mxu1 %v1325_v46 }
  0x36   :  { %318 = vmatpush.bf16.msra.mxu2 %v1341_v61 }
  0x38   :  { %292 = vmatpush.bf16.msra.mxu0 %v1309_v52 }
  0x39   :  { %306 = vmatpush.bf16.msra.mxu1 %v1313_v55 }
  0x3a   :  { %319 = vmatpush.bf16.msra.mxu2 %v1329_v4 }
  0x3c   :  { %293 = vmatpush.bf16.msra.mxu0 %v1297_v62 }
  0x3d   :  { %307 = vmatpush.bf16.msra.mxu1 %v1301_v2 }
  0x3e   :  { %320 = vmatpush.bf16.msra.mxu2 %v1317_v7 }
  0x3f   :  { %294 = vmatmul.bf16.vlgmr.msra.gmra.mxu0 %v122_v3 }
  0x40   :  { %308 = vmatmul.bf16.vlgmr.msra.gmra.mxu1 %v122_v3 }
  0x42   :  { %321 = vmatpush.bf16.msra.mxu2 %v1305_v10 }
  0x45   :  { %322 = vmatmul.bf16.vlgmr.msra.gmra.mxu2 %v122_v3 }
  0xbc   :  { %v295_v18 = vpop.f32.mrf.mxu0 }
  0xbd   :  { %v309_v14 = vpop.f32.mrf.mxu1  ;;  %v296_v19 = vadd.f32 %v295_v18, %v155_v15 }
  0xbe   :  { %v310_v16 = vadd.f32 %v309_v14, %v156_v12 }
  0xbf   :  { %v328_v21 = vpack.c.bf16 %v296_v19, %v296_v19 }
  0xc0   :  { %v329_v17 = vpack.c.bf16 %v310_v16, %v310_v16 }
  0xc2   :  { %457 = vrot.lane.b32.xlu2 %v329_v17, %s1799_s1  ;;  %392 = vrot.lane.b32.xlu1 %v329_v17, %s1807_s4  ;;  %v336_v20 = vsel %vm331_vm0, %v329_v17, 0 }
  0xc3   :  { %345 = vmatpush.bf16.xpose.msrb.mxu0 %v336_v20 }
  0xc4   :  { %v297_v25 = vpop.f32.mrf.mxu0 }
  0xc5   :  { %v311_v22 = vpop.f32.mrf.mxu1  ;;  %v298_v26 = vadd.f32 %v297_v25, %v155_v15 }
  0xc6   :  { %v312_v23 = vadd.f32 %v311_v22, %v156_v12 }
  0xc7   :  { %v583_v27 = vpack.c.bf16 %v298_v26, %v298_v26 }
  0xc8   :  { %v584_v24 = vpack.c.bf16 %v312_v23, %v312_v23  ;;  %v323_v29 = vpop.f32.mrf.mxu2 }
  0xc9   :  { %v324_v31 = vadd.f32 %v323_v29, %v157_v30 }
  0xca   :  { %521 = vrot.lane.b32.xlu2 %v329_v17, %s1808_s5  ;;  %389 = vrot.lane.b32.xlu1 %v328_v21, %s1807_s4  ;;  %v590_v36 = vsel %vm331_vm0, %v584_v24, 0 }
  0xcb   :  { %1390 = vmatmul.msk.bf16.vlgmr.msrb.gmra.mxu0 %vm331_vm0, %v328_v21  ;;  %v1898_v32 = vpack.c.bf16 %v324_v31, %v324_v31 }
  0xcd   :  { %v370_v33 = vsel %vm368_vm1, %v1898_v32, 0 }
  0xce   :  { %379 = vmatpush.bf16.msra.mxu3 %v370_v33 }
  0xd2   :  { %643 = vrot.lane.b32.xlu2 %v584_v24, %s1807_s4  ;;  %519 = vrot.lane.b32.xlu1 %v328_v21, %s1808_s5 }
  0xda   :  { %707 = vrot.lane.b32.xlu2 %v584_v24, %s1799_s1  ;;  %640 = vrot.lane.b32.xlu1 %v583_v27, %s1807_s4 }
  0xe2   :  { %705 = vrot.lane.b32.xlu2 %v583_v27, %s1799_s1  ;;  %770 = vrot.lane.b32.xlu1 %v584_v24, %s1808_s5 }
 0x11c   :  { %v458_v34 = vpop.permute.xlu2 %457 }
 0x11d   :  { %v463_v35 = vsel %vm331_vm0, %v458_v34, 0 }
 0x11e   :  { %472 = vmatpush.bf16.xpose.msrb.mxu1 %v463_v35 }
 0x124   :  { %v522_v48 = vpop.permute.xlu2 %521 }
 0x125   :  { %v527_v55 = vsel %vm331_vm0, %v522_v48, 0 }
 0x126   :  { %599 = vmatpush.bf16.xpose.msra.mxu1 %v590_v36 }
 0x12c   :  { %v644_v51 = vpop.permute.xlu2 %643 }
 0x12d   :  { %v649_v61 = vsel %vm331_vm0, %v644_v51, 0 }
 0x134   :  { %v393_v37 = vpop.permute.xlu1 %392  ;;  %v708_v56 = vpop.permute.xlu2 %707 }
 0x135   :  { %v398_v38 = vsel %vm331_vm0, %v393_v37, 0  ;;  %v713_v58 = vsel %vm331_vm0, %v708_v56, 0 }
 0x136   :  { %407 = vmatpush.bf16.xpose.msrb.mxu3 %v398_v38 }
 0x13c   :  { %v390_v54 = vpop.permute.xlu1 %389  ;;  %v706_v2 = vpop.permute.xlu2 %705 }
 0x144   :  { %v520_v59 = vpop.permute.xlu1 %519 }
 0x148   :  { %v347_v39 = vpop.f32.mrf.mxu0 }
 0x149   :  { %v351_v40 = vmul.f32 0.35355338, %v347_v39 }
 0x14b   :  { %v353_v41 = vsel %vm352_vm2, %v351_v40, -inf }
 0x14c   :  { %354 = vmax.xlane.f32.xlu0 %v353_v41  ;;  %v641_v62 = vpop.permute.xlu1 %640 }
 0x150   :  { %v349_v42 = vpop.f32.mrf.mxu0 }
 0x154   :  { %v771_v0 = vpop.permute.xlu1 %770 }
 0x155   :  { %v776_v1 = vsel %vm331_vm0, %v771_v0, 0 }
 0x1bf   :  { %v355_v43 = vpop.xlane.xlu0 %354 }
 0x1c0   :  { %v356_v44 = vsub.f32 %v351_v40, %v355_v43 }
 0x1c2   :  { %v357_v45 = vmul.f32 1.442695, %v356_v44 }
 0x1c4   :  { %1572 = vpow2.f32 %v357_v45 }
 0x1ca   :  { %v1573_v46 = vpop.eup %1572 }
 0x1cb   :  { %v359_v47 = vsel %vm352_vm2, %v1573_v46, 0.0 }
 0x1cc   :  { %360 = vadd.xlane.f32.xlu0 %v359_v47 }
 0x1e0   :  { %455 = vrot.lane.b32.xlu0 %v328_v21, %s1799_s1 }
 0x1e8   :  { %768 = vrot.lane.b32.xlu0 %v583_v27, %s1808_s5 }
 0x23f   :  { %v361_v49 = vpop.xlane.xlu0 %360 }
 0x240   :  { %1574 = vrcp.f32 %v361_v49 }
 0x246   :  { %v1575_v50 = vpop.eup %1574 }
 0x247   :  { %v363_v52 = vmul.f32 %v1575_v50, %v1573_v46 }
 0x249   :  { %v364_v53 = vpack.c.bf16 %v363_v52, %v363_v52 }
 0x24b   :  { %1391 = vmatmul.msk.bf16.vlgmr.msra.gmra.mxu3 %vm352_vm2, %v364_v53 }
 0x24c   :  { %536 = vmatpush.bf16.xpose.msra.mxu3 %v527_v55 }
 0x252   :  { %v456_v57 = vpop.permute.xlu0 %455 }
 0x253   :  { %1394 = vmatmul.msk.bf16.vlgmr.msrb.gmra.mxu1 %vm331_vm0, %v456_v57 }
 0x254   :  { %722 = vmatpush.bf16.xpose.msrb.mxu1 %v713_v58 }
 0x25a   :  { %v769_v3 = vpop.permute.xlu0 %768 }
 0x25b   :  { %1392 = vmatmul.msk.bf16.vlgmr.msrb.gmra.mxu3 %vm331_vm0, %v390_v54 }
 0x25c   :  { %658 = vmatpush.bf16.xpose.msrb.mxu3 %v649_v61 }
 0x263   :  { %1398 = vmatmul.msk.bf16.vlgmr.msra.gmra.mxu1 %vm331_vm0, %v583_v27 }
 0x26b   :  { %1396 = vmatmul.msk.bf16.vlgmr.msra.gmra.mxu3 %vm331_vm0, %v520_v59 }
 0x26c   :  { %785 = vmatpush.bf16.xpose.msra.mxu3 %v776_v1 }
 0x273   :  { %1402 = vmatmul.msk.bf16.vlgmr.msrb.gmra.mxu1 %vm331_vm0, %v706_v2  ;;  %v325_v2 = vpop.f32.mrf.mxu2 }
 0x27b   :  { %1400 = vmatmul.msk.bf16.vlgmr.msrb.gmra.mxu3 %vm331_vm0, %v641_v62 }
 0x28b   :  { %1404 = vmatmul.msk.bf16.vlgmr.msra.gmra.mxu3 %vm331_vm0, %v769_v3 }
 0x2ce   :  { %v381_v4 = vpop.f32.mrf.mxu3 }
 0x2cf   :  { %v385_v5 = vpack.c.bf16 %v381_v4, %v381_v4 }
 0x2d0   :  { %v474_v6 = vpop.f32.mrf.mxu1 }
 0x2d1   :  { %387 = vst.msk [vmem:[#allocation2] sm:$0xf] %vm386_vm3, %v385_v5  ;;  %v478_v7 = vmul.f32 0.35355338, %v474_v6  ;;  %v326_v5 = vadd.f32 %v325_v2, %v157_v30 }
 0x2d3   :  { %v479_v8 = vsel %vm352_vm2, %v478_v7, -inf }
 0x2d4   :  { %480 = vmax.xlane.f32.xlu2 %v479_v8 }
 0x2d6   :  { %v383_v9 = vpop.f32.mrf.mxu3 }
 0x2d8   :  { %v476_v10 = vpop.f32.mrf.mxu1 }
 0x2de   :  { %v409_v11 = vpop.f32.mrf.mxu3 }
 0x2df   :  { %v413_v12 = vmul.f32 0.35355338, %v409_v11 }
 0x2e0   :  { %v601_v14 = vpop.f32.mrf.mxu1 }
 0x2e1   :  { %v605_v15 = vmul.f32 0.35355338, %v601_v14  ;;  %v414_v16 = vsel %vm352_vm2, %v413_v12, -inf }
 0x2e2   :  { %415 = vmax.xlane.f32.xlu1 %v414_v16 }
 0x2e3   :  { %v606_v17 = vsel %vm352_vm2, %v605_v15, -inf }
 0x2e4   :  { %607 = vmax.xlane.f32.xlu2 %v606_v17 }
 0x2e6   :  { %v411_v18 = vpop.f32.mrf.mxu3 }
 0x2e8   :  { %v603_v19 = vpop.f32.mrf.mxu1 }
 0x2ee   :  { %v538_v20 = vpop.f32.mrf.mxu3 }
 0x2ef   :  { %v542_v25 = vmul.f32 0.35355338, %v538_v20 }
 0x2f0   :  { %v724_v21 = vpop.f32.mrf.mxu1 }
 0x2f1   :  { %v1925_v22 = vmul.f32 0.35355338, %v724_v21  ;;  %v543_v27 = vsel %vm352_vm2, %v542_v25, -inf }
 0x2f3   :  { %v729_v23 = vsel %vm352_vm2, %v1925_v22, -inf }
 0x2f4   :  { %730 = vmax.xlane.f32.xlu0 %v729_v23 }
 0x2f6   :  { %v540_v24 = vpop.f32.mrf.mxu3 }
 0x2f8   :  { %v726_v26 = vpop.f32.mrf.mxu1 }
 0x2fc   :  { %544 = vmax.xlane.f32.xlu0 %v543_v27 }
 0x2fe   :  { %v660_v29 = vpop.f32.mrf.mxu3 }
 0x2ff   :  { %v664_v31 = vmul.f32 0.35355338, %v660_v29 }
 0x301   :  { %v665_v33 = vsel %vm352_vm2, %v664_v31, -inf }
 0x302   :  { %666 = vmax.xlane.f32.xlu1 %v665_v33 }
 0x306   :  { %v662_v34 = vpop.f32.mrf.mxu3 }
 0x30e   :  { %v787_v35 = vpop.f32.mrf.mxu3 }
 0x30f   :  { %v791_v44 = vmul.f32 0.35355338, %v787_v35 }
 0x310   :  { %427 = vrot.lane.b32.xlu0 %v1898_v32, %s1807_s4 }
 0x311   :  { %v792_v49 = vsel %vm352_vm2, %v791_v44, -inf }
 0x316   :  { %v789_v36 = vpop.f32.mrf.mxu3 }
 0x31b   :  { %555 = vrot.lane.b32.xlu1 %v1898_v32, %s1808_s5 }
 0x347   :  { %v481_v37 = vpop.xlane.xlu2 %480 }
 0x348   :  { %v482_v38 = vsub.f32 %v478_v7, %v481_v37 }
 0x34a   :  { %v483_v39 = vmul.f32 1.442695, %v482_v38 }
 0x34c   :  { %1576 = vpow2.f32 %v483_v39 }
 0x352   :  { %v1577_v40 = vpop.eup %1576 }
 0x353   :  { %v485_v41 = vsel %vm352_vm2, %v1577_v40, 0.0 }
 0x354   :  { %486 = vadd.xlane.f32.xlu2 %v485_v41 }
 0x355   :  { %v416_v42 = vpop.xlane.xlu1 %415 }
 0x356   :  { %v417_v43 = vsub.f32 %v413_v12, %v416_v42 }
 0x357   :  { %v608_v45 = vpop.xlane.xlu2 %607 }
 0x358   :  { %v418_v46 = vmul.f32 1.442695, %v417_v43  ;;  %v609_v47 = vsub.f32 %v605_v15, %v608_v45 }
 0x35a   :  { %1578 = vpow2.f32 %v418_v46  ;;  %v610_v48 = vmul.f32 1.442695, %v609_v47 }
 0x35c   :  { %1580 = vpow2.f32 %v610_v48  ;;  %793 = vmax.xlane.f32.xlu2 %v792_v49 }
 0x360   :  { %v1579_v50 = vpop.eup %1578 }
 0x361   :  { %v420_v51 = vsel %vm352_vm2, %v1579_v50, 0.0 }
 0x362   :  { %v1938_v52 = vpop.eup %1580  ;;  %421 = vadd.xlane.f32.xlu1 %v420_v51 }
 0x363   :  { %v612_v53 = vsel %vm352_vm2, %v1938_v52, 0.0 }
 0x364   :  { %613 = vadd.xlane.f32.xlu0 %v612_v53 }
 0x367   :  { %v731_v54 = vpop.xlane.xlu0 %730 }
 0x368   :  { %v732_v9 = vsub.f32 %v1925_v22, %v731_v54 }
 0x36a   :  { %v733_v10 = vmul.f32 1.442695, %v732_v9 }
 0x36f   :  { %v545_v55 = vpop.xlane.xlu0 %544 }
 0x370   :  { %v546_v56 = vsub.f32 %v542_v25, %v545_v55 }
 0x372   :  { %v547_v57 = vmul.f32 1.442695, %v546_v56 }
 0x374   :  { %1582 = vpow2.f32 %v547_v57  ;;  %491 = vrot.lane.b32.xlu2 %v1898_v32, %s1799_s1  ;;  %v585_v32 = vpack.c.bf16 %v326_v5, %v326_v5 }
 0x375   :  { %v667_v0 = vpop.xlane.xlu1 %666 }
 0x376   :  { %v668_v1 = vsub.f32 %v664_v31, %v667_v0  ;;  %v622_v21 = vsel %vm368_vm1, %v585_v32, 0 }
 0x378   :  { %v669_v6 = vmul.f32 1.442695, %v668_v1 }
 0x37a   :  { %v1583_v58 = vpop.eup %1582  ;;  %1584 = vpow2.f32 %v669_v6 }
 0x37b   :  { %v549_v59 = vsel %vm352_vm2, %v1583_v58, 0.0  ;;  %1586 = vpow2.f32 %v733_v10 }
 0x37c   :  { %550 = vadd.xlane.f32.xlu1 %v549_v59 }
 0x380   :  { %v1585_v7 = vpop.eup %1584 }
 0x381   :  { %v671_v8 = vsel %vm352_vm2, %v1585_v7, 0.0  ;;  %v1953_v11 = vpop.eup %1586 }
 0x382   :  { %v428_v61 = vpop.permute.xlu0 %427  ;;  %v735_v28 = vsel %vm352_vm2, %v1953_v11, 0.0 }
 0x383   :  { %v433_v62 = vsel %vm368_vm1, %v428_v61, 0 }
 0x384   :  { %442 = vmatpush.bf16.msra.mxu0 %v433_v62 }
 0x38d   :  { %v556_v3 = vpop.permute.xlu1 %555 }
 0x38e   :  { %v561_v4 = vsel %vm368_vm1, %v556_v3, 0 }
 0x38f   :  { %570 = vmatpush.bf16.msrb.mxu0 %v561_v4 }
 0x395   :  { %678 = vrot.lane.b32.xlu1 %v585_v32, %s1807_s4 }
 0x39d   :  { %672 = vadd.xlane.f32.xlu2 %v671_v8 }
 0x3b5   :  { %804 = vrot.lane.b32.xlu2 %v585_v32, %s1808_s5 }
 0x3bf   :  { %736 = vadd.xlane.f32.xlu1 %v735_v28 }
 0x3c7   :  { %v487_v30 = vpop.xlane.xlu2 %486 }
 0x3c8   :  { %1588 = vrcp.f32 %v487_v30 }
 0x3ce   :  { %v1589_v16 = vpop.eup %1588 }
 0x3cf   :  { %v794_v12 = vpop.xlane.xlu2 %793  ;;  %v489_v18 = vmul.f32 %v1589_v16, %v1577_v40  ;;  %v1540_v16 = vld [vmem:[#allocation8 + $0x38] sm:$0xff] }
 0x3d0   :  { %v795_v14 = vsub.f32 %v791_v44, %v794_v12  ;;  %904 = vmatpush.bf16.msra.mxu1 %v1540_v16 }
 0x3d1   :  { %v490_v24 = vpack.c.bf16 %v489_v18, %v489_v18  ;;  %v1538_v18 = vld [vmem:[#allocation8 + $0x28] sm:$0xff] }
 0x3d2   :  { %v796_v15 = vmul.f32 1.442695, %v795_v14 }
 0x3d4   :  { %1590 = vpow2.f32 %v796_v15 }
 0x3d5   :  { %v422_v17 = vpop.xlane.xlu1 %421 }
 0x3d6   :  { %1592 = vrcp.f32 %v422_v17  ;;  %v1539_v17 = vld [vmem:[#allocation8 + $0x30] sm:$0xff] }
 0x3d7   :  { %v492_v19 = vpop.permute.xlu2 %491  ;;  %v614_v23 = vpop.xlane.xlu0 %613  ;;  %905 = vmatpush.bf16.msra.mxu1 %v1539_v17  ;;  %v967_v17 = vperm.slane %v1878_v13, 3 }
 0x3d8   :  { %v497_v20 = vsel %vm368_vm1, %v492_v19, 0  ;;  %1594 = vrcp.f32 %v614_v23  ;;  %v1537_v19 = vld [vmem:[#allocation8 + $0x20] sm:$0xff]  ;;  %v1535_v23 = vld [vmem:[#allocation8 + $0x10] sm:$0xff] }
 0x3d9   :  { %506 = vmatpush.bf16.msrb.mxu2 %v497_v20 }
 0x3da   :  { %v1591_v22 = vpop.eup %1590 }
 0x3db   :  { %v798_v25 = vsel %vm352_vm2, %v1591_v22, 0.0  ;;  %906 = vmatpush.bf16.msra.mxu1 %v1538_v18 }
 0x3dc   :  { %v1593_v26 = vpop.eup %1592  ;;  %799 = vadd.xlane.f32.xlu0 %v798_v25  ;;  %1395 = vmatmul.msk.bf16.vlgmr.msrb.gmra.mxu2 %vm352_vm2, %v490_v24  ;;  %v1534_v24 = vld [vmem:[#allocation8 + $0x8] sm:$0xff]  ;;  %v1533_v25 = vld [vmem:[#allocation8] sm:$0xff] }
 0x3dd   :  { %631 = vmatpush.bf16.msra.mxu2 %v622_v21  ;;  %v424_v27 = vmul.f32 %v1593_v26, %v1579_v50 }
 0x3de   :  { %v1595_v31 = vpop.eup %1594 }
 0x3df   :  { %v425_v29 = vpack.c.bf16 %v424_v27, %v424_v27  ;;  %v616_v33 = vmul.f32 %v1595_v31, %v1938_v52  ;;  %907 = vmatpush.bf16.msra.mxu1 %v1537_v19  ;;  %v849_v31 = vperm.slane %v1878_v13, 1 }
 0x3e1   :  { %1393 = vmatmul.msk.bf16.vlgmr.msra.gmra.mxu0 %vm352_vm2, %v425_v29  ;;  %v617_v34 = vpack.c.bf16 %v616_v33, %v616_v33 }
 0x3ec   :  { %1399 = vmatmul.msk.bf16.vlgmr.msra.gmra.mxu2 %vm352_vm2, %v617_v34 }
 0x3ef   :  { %v551_v35 = vpop.xlane.xlu1 %550 }
 0x3f0   :  { %1596 = vrcp.f32 %v551_v35  ;;  %741 = vrot.lane.b32.xlu0 %v585_v32, %s1799_s1 }
 0x3f6   :  { %v1597_v36 = vpop.eup %1596 }
 0x3f7   :  { %v553_v37 = vmul.f32 %v1597_v36, %v1583_v58 }
 0x3f9   :  { %v554_v38 = vpack.c.bf16 %v553_v37, %v553_v37 }
 0x3fb   :  { %1397 = vmatmul.msk.bf16.vlgmr.msrb.gmra.mxu0 %vm352_vm2, %v554_v38 }
 0x407   :  { %v679_v39 = vpop.permute.xlu1 %678 }
 0x408   :  { %v684_v40 = vsel %vm368_vm1, %v679_v39, 0 }
 0x409   :  { %693 = vmatpush.bf16.msra.mxu0 %v684_v40 }
 0x410   :  { %v673_v41 = vpop.xlane.xlu2 %672 }
 0x411   :  { %1598 = vrcp.f32 %v673_v41  ;;  %v1548_v41 = vld [vmem:[#allocation9 + $0x38] sm:$0xff] }
 0x417   :  { %v1599_v42 = vpop.eup %1598 }
 0x418   :  { %v675_v43 = vmul.f32 %v1599_v42, %v1585_v7  ;;  %v805_v44 = vpop.permute.xlu2 %804  ;;  %v1547_v42 = vld [vmem:[#allocation9 + $0x30] sm:$0xff] }
 0x419   :  { %v810_v45 = vsel %vm368_vm1, %v805_v44, 0  ;;  %v1545_v44 = vld [vmem:[#allocation9 + $0x20] sm:$0xff] }
 0x41a   :  { %v676_v46 = vpack.c.bf16 %v675_v43, %v675_v43  ;;  %819 = vmatpush.bf16.msrb.mxu0 %v810_v45  ;;  %v1546_v43 = vld [vmem:[#allocation9 + $0x28] sm:$0xff]  ;;  %v1544_v45 = vld [vmem:[#allocation9 + $0x18] sm:$0xff] }
 0x41c   :  { %1401 = vmatmul.msk.bf16.vlgmr.msra.gmra.mxu0 %vm352_vm2, %v676_v46 }
 0x432   :  { %v737_v48 = vpop.xlane.xlu1 %736 }
 0x44f   :  { %v800_v47 = vpop.xlane.xlu0 %799 }
 0x450   :  { %1600 = vrcp.f32 %v800_v47 }
 0x451   :  { %1602 = vrcp.f32 %v737_v48 }
 0x456   :  { %v1601_v49 = vpop.eup %1600 }
 0x457   :  { %v802_v50 = vmul.f32 %v1601_v49, %v1591_v22  ;;  %v1603_v52 = vpop.eup %1602  ;;  %v1536_v22 = vld [vmem:[#allocation8 + $0x18] sm:$0xff] }
 0x458   :  { %v739_v57 = vmul.f32 %v1603_v52, %v1953_v11  ;;  %908 = vmatpush.bf16.msra.mxu1 %v1536_v22  ;;  %v1541_v52 = vld [vmem:[#allocation9] sm:$0xff]  ;;  %v987_v22 = vperm.slane %v1878_v13, 4 }
 0x459   :  { %v803_v51 = vpack.c.bf16 %v802_v50, %v802_v50  ;;  %v1542_v50 = vld [vmem:[#allocation9 + $0x8] sm:$0xff] }
 0x45a   :  { %v740_v61 = vpack.c.bf16 %v739_v57, %v739_v57 }
 0x45b   :  { %1405 = vmatmul.msk.bf16.vlgmr.msrb.gmra.mxu0 %vm352_vm2, %v803_v51 }
 0x45c   :  { %909 = vmatpush.bf16.msra.mxu1 %v1535_v23 }
 0x45e   :  { %v444_v53 = vpop.f32.mrf.mxu0 }
 0x45f   :  { %v448_v54 = vpack.c.bf16 %v444_v53, %v444_v53  ;;  %v508_v55 = vpop.f32.mrf.mxu2 }
 0x460   :  { %v512_v56 = vpack.c.bf16 %v508_v55, %v508_v55  ;;  %910 = vmatpush.bf16.msra.mxu1 %v1534_v24 }
 0x461   :  { %450 = vrot.lane.b32.xlu1 %v448_v54, %s1808_s5 }
 0x462   :  { %514 = vrot.lane.b32.xlu0 %v512_v56, %s1799_s1  ;;  %v742_v58 = vpop.permute.xlu0 %741 }
 0x463   :  { %v747_v59 = vsel %vm368_vm1, %v742_v58, 0 }
 0x464   :  { %756 = vmatpush.bf16.msrb.mxu2 %v747_v59  ;;  %911 = vmatpush.bf16.msra.mxu1 %v1533_v25  ;;  %v1556_v25 = vld [vmem:[#allocation11 + $0x38] sm:$0xff] }
 0x465   :  { %1204 = vmatpush.bf16.msrb.mxu3 %v1556_v25 }
 0x466   :  { %v446_v62 = vpop.f32.mrf.mxu0 }
 0x467   :  { %v510_v0 = vpop.f32.mrf.mxu2  ;;  %1403 = vmatmul.msk.bf16.vlgmr.msrb.gmra.mxu2 %vm352_vm2, %v740_v61 }
 0x468   :  { %1036 = vmatpush.bf16.msra.mxu2 %v1548_v41 }
 0x46c   :  { %1037 = vmatpush.bf16.msra.mxu2 %v1547_v42  ;;  %v1553_v42 = vld [vmem:[#allocation11 + $0x20] sm:$0xff] }
 0x46f   :  { %v633_v1 = vpop.f32.mrf.mxu2 }
 0x470   :  { %v637_v2 = vpack.c.bf16 %v633_v1, %v633_v1  ;;  %1038 = vmatpush.bf16.msra.mxu2 %v1546_v43 }
 0x472   :  { %638 = vst.msk [vmem:[#allocation2 + $0x4] sm:$0xf] %vm386_vm3, %v637_v2 }
 0x474   :  { %1039 = vmatpush.bf16.msra.mxu2 %v1545_v44 }
 0x477   :  { %v635_v3 = vpop.f32.mrf.mxu2 }
 0x478   :  { %v572_v4 = vpop.f32.mrf.mxu0  ;;  %1040 = vmatpush.bf16.msra.mxu2 %v1544_v45 }
 0x479   :  { %v576_v8 = vpack.c.bf16 %v572_v4, %v572_v4 }
 0x480   :  { %v574_v5 = vpop.f32.mrf.mxu0 }
 0x499   :  { %v695_v6 = vpop.f32.mrf.mxu0 }
 0x49a   :  { %v699_v32 = vpack.c.bf16 %v695_v6, %v695_v6 }
 0x49c   :  { %701 = vrot.lane.b32.xlu0 %v699_v32, %s1808_s5 }
 0x4a1   :  { %v697_v7 = vpop.f32.mrf.mxu0 }
 0x4a4   :  { %578 = vrot.lane.b32.xlu0 %v576_v8, %s1807_s4 }
 0x4d3   :  { %v451_v9 = vpop.permute.xlu1 %450 }
 0x4d4   :  { %454 = vst.msk [vmem:[#allocation2] sm:$0xf] %vm453_vm4, %v451_v9  ;;  %v515_v10 = vpop.permute.xlu0 %514 }
 0x4d5   :  { %518 = vst.msk [vmem:[#allocation2] sm:$0xf] %vm517_vm5, %v515_v10 }
 0x4d8   :  { %v821_v11 = vpop.f32.mrf.mxu0 }
 0x4d9   :  { %v825_v15 = vpack.c.bf16 %v821_v11, %v821_v11 }
 0x4e0   :  { %v823_v28 = vpop.f32.mrf.mxu0 }
 0x4e1   :  { %v964_v28 = vperm.slane %v1878_v13, 2 }
 0x4ea   :  { %v758_v30 = vpop.f32.mrf.mxu2 }
 0x4eb   :  { %v762_v12 = vpack.c.bf16 %v758_v30, %v758_v30 }
 0x4ed   :  { %764 = vrot.lane.b32.xlu2 %v762_v12, %s1799_s1 }
 0x4f2   :  { %v760_v14 = vpop.f32.mrf.mxu2 }
 0x4f5   :  { %827 = vrot.lane.b32.xlu2 %v825_v15, %s1807_s4 }
 0x50e   :  { %v702_v20 = vpop.permute.xlu0 %701 }
 0x50f   :  { %704 = vst.msk [vmem:[#allocation2 + $0x4] sm:$0xf] %vm453_vm4, %v702_v20 }
 0x516   :  { %v579_v21 = vpop.permute.xlu0 %578 }
 0x517   :  { %582 = vst.msk [vmem:[#allocation2] sm:$0xf] %vm581_vm6, %v579_v21 }
 0x547   :  { %v765_v26 = vpop.permute.xlu2 %764 }
 0x548   :  { %767 = vst.msk [vmem:[#allocation2 + $0x4] sm:$0xf] %vm517_vm5, %v765_v26 }
 0x54f   :  { %v828_v27 = vpop.permute.xlu2 %827 }
 0x550   :  { %830 = vst.msk [vmem:[#allocation2 + $0x4] sm:$0xf] %vm581_vm6, %v828_v27 }
 0x557   :  { %v1532_v29 = vld [vmem:[#allocation2] sm:$0xff] }
 0x558   :  { %912 = vmatmul.bf16.vlgmr.msra.gmra.mxu1 %v1532_v29  ;;  %v1555_v29 = vld [vmem:[#allocation11 + $0x30] sm:$0xff] }
 0x559   :  { %1205 = vmatpush.bf16.msrb.mxu3 %v1555_v29 }
 0x5d5   :  { %v913_v33 = vpop.f32.mrf.mxu1 }
 0x5d6   :  { %v914_v34 = vadd.f32 %v913_v33, %v849_v31 }
 0x5d8   :  { %v918_v35 = vadd.f32 %v914_v34, %v1872_v60  ;;  %v1543_v60 = vld [vmem:[#allocation9 + $0x10] sm:$0xff] }
 0x5d9   :  { %1041 = vmatpush.bf16.msra.mxu2 %v1543_v60 }
 0x5da   :  { %920 = vadd.xlane.f32.xlu1 %v918_v35  ;;  %v926_v36 = vmul.f32 %v918_v35, %v918_v35 }
 0x5dc   :  { %928 = vadd.xlane.f32.xlu2 %v926_v36 }
 0x5dd   :  { %v915_v37 = vpop.f32.mrf.mxu1  ;;  %1042 = vmatpush.bf16.msra.mxu2 %v1542_v50 }
 0x5de   :  { %v916_v38 = vadd.f32 %v915_v37, %v849_v31  ;;  %v1554_v37 = vld [vmem:[#allocation11 + $0x28] sm:$0xff] }
 0x5df   :  { %1206 = vmatpush.bf16.msrb.mxu3 %v1554_v37 }
 0x5e0   :  { %v919_v39 = vadd.f32 %v916_v38, %v1874_v63 }
 0x5e1   :  { %1043 = vmatpush.bf16.msra.mxu2 %v1541_v52 }
 0x5e2   :  { %922 = vadd.xlane.f32.xlu0 %v919_v39  ;;  %v927_v40 = vmul.f32 %v919_v39, %v919_v39 }
 0x5e3   :  { %1207 = vmatpush.bf16.msrb.mxu3 %v1553_v42 }
 0x5e4   :  { %930 = vadd.xlane.f32.xlu1 %v927_v40 }
 0x64d   :  { %v921_v46 = vpop.xlane.xlu1 %920 }
 0x64e   :  { %v924_v47 = vmul.f32 0.03125, %v921_v46 }
 0x64f   :  { %v929_v48 = vpop.xlane.xlu2 %928 }
 0x650   :  { %v934_v49 = vmul.f32 %v924_v47, %v924_v47  ;;  %v932_v63 = vmul.f32 0.03125, %v929_v48  ;;  %v938_v9 = vsub.f32 %v918_v35, %v924_v47  ;;  %v1552_v47 = vld [vmem:[#allocation11 + $0x18] sm:$0xff] }
 0x651   :  { %1208 = vmatpush.bf16.msrb.mxu3 %v1552_v47 }
 0x652   :  { %v936_v51 = vsub.f32 %v932_v63, %v934_v49 }
 0x654   :  { %v940_v53 = vadd.f32 1e-05, %v936_v51 }
 0x655   :  { %v923_v54 = vpop.xlane.xlu0 %922 }
 0x656   :  { %1604 = vrsqrt.f32 %v940_v53  ;;  %v925_v55 = vmul.f32 0.03125, %v923_v54  ;;  %vm948_vm8 = vweird.f32 %v940_v53  ;;  %v1551_v54 = vld [vmem:[#allocation11 + $0x10] sm:$0xff] }
 0x657   :  { %v931_v56 = vpop.xlane.xlu1 %930  ;;  %1209 = vmatpush.bf16.msrb.mxu3 %v1551_v54 }
 0x658   :  { %v935_v57 = vmul.f32 %v925_v55, %v925_v55  ;;  %v933_v58 = vmul.f32 0.03125, %v931_v56  ;;  %v939_v12 = vsub.f32 %v919_v39, %v925_v55 }
 0x65a   :  { %v937_v59 = vsub.f32 %v933_v58, %v935_v57 }
 0x65c   :  { %v1605_v61 = vpop.eup %1604  ;;  %v941_v62 = vadd.f32 1e-05, %v937_v59 }
 0x65d   :  { %v943_v0 = vmul.f32 %v1605_v61, %v940_v53  ;;  %vm949_vm7 = vweird.f32 %v1605_v61 }
 0x65e   :  { %1606 = vrsqrt.f32 %v941_v62  ;;  %vm950_vm9 = vmor %vm948_vm8, %vm949_vm7  ;;  %vm958_vm11 = vweird.f32 %v941_v62 }
 0x65f   :  { %v944_v1 = vmul.f32 %v1605_v61, %v943_v0  ;;  %v1550_v0 = vld [vmem:[#allocation11 + $0x8] sm:$0xff] }
 0x660   :  { %1210 = vmatpush.bf16.msrb.mxu3 %v1550_v0 }
 0x661   :  { %v945_v2 = vmul.f32 0.5, %v944_v1 }
 0x663   :  { %v946_v3 = vsub.f32 1.5, %v945_v2 }
 0x664   :  { %v1607_v4 = vpop.eup %1606 }
 0x665   :  { %v947_v5 = vmul.f32 %v1605_v61, %v946_v3  ;;  %v953_v6 = vmul.f32 %v1607_v4, %v941_v62  ;;  %vm959_vm10 = vweird.f32 %v1607_v4 }
 0x666   :  { %vm960_vm12 = vmor %vm958_vm11, %vm959_vm10 }
 0x667   :  { %v954_v32 = vmul.f32 %v1607_v4, %v953_v6  ;;  %v951_v7 = vsel %vm950_vm9, %v1605_v61, %v947_v5  ;;  %v1549_v6 = vld [vmem:[#allocation11] sm:$0xff] }
 0x668   :  { %v962_v11 = vmul.f32 %v951_v7, %v938_v9  ;;  %1211 = vmatpush.bf16.msrb.mxu3 %v1549_v6 }
 0x669   :  { %v955_v8 = vmul.f32 0.5, %v954_v32 }
 0x66a   :  { %v965_v16 = vmul.f32 %v964_v28, %v962_v11 }
 0x66b   :  { %v956_v10 = vsub.f32 1.5, %v955_v8 }
 0x66c   :  { %v1989_v19 = vadd.f32 %v967_v17, %v965_v16 }
 0x66d   :  { %v957_v30 = vmul.f32 %v1607_v4, %v956_v10 }
 0x66f   :  { %v961_v14 = vsel %vm960_vm12, %v1607_v4, %v957_v30 }
 0x670   :  { %v963_v15 = vmul.f32 %v961_v14, %v939_v12 }
 0x672   :  { %v966_v18 = vmul.f32 %v964_v28, %v963_v15 }
 0x674   :  { %v1991_v20 = vadd.f32 %v967_v17, %v966_v18 }
 0x676   :  { %v970_v21 = vpack.c.bf16 %v1991_v20, %v1989_v19 }
 0x678   :  { %1044 = vmatmul.bf16.vlgmr.msra.gmra.mxu2 %v970_v21 }
 0x6fb   :  { %v1045_v23 = vpop.f32.mrf.mxu2 }
 0x6fc   :  { %v1996_v24 = vadd.f32 %v1045_v23, %v987_v22 }
 0x6fe   :  { %v1999_v26 = vmul.f32 0.70710677, %v1996_v24 }
 0x700   :  { %v1054_v27 = vmul.f32 %v1999_v26, %v1999_v26 }
 0x702   :  { %v1055_v31 = vmin.f32 %v1054_v27, 16.0 }
 0x703   :  { %v1047_v33 = vpop.f32.mrf.mxu2 }
 0x704   :  { %v1056_v34 = vmul.f32 2.1237322e-06, %v1055_v31  ;;  %v1067_v35 = vmul.f32 3.8918573e-05, %v1055_v31  ;;  %v2003_v36 = vadd.f32 %v1047_v33, %v987_v22 }
 0x706   :  { %v1057_v38 = vadd.f32 0.00028619796, %v1056_v34  ;;  %v1068_v39 = vadd.f32 0.001143296, %v1067_v35  ;;  %v2006_v40 = vmul.f32 0.70710677, %v2003_v36 }
 0x708   :  { %v1069_v41 = vmul.f32 %v1068_v39, %v1055_v31  ;;  %v1094_v43 = vmul.f32 %v2006_v40, %v2006_v40  ;;  %v1058_v44 = vmul.f32 %v1057_v38, %v1055_v31 }
 0x70a   :  { %v1070_v45 = vadd.f32 0.014752088, %v1069_v41  ;;  %v1095_v60 = vmin.f32 %v1094_v43, 16.0  ;;  %v1059_v63 = vadd.f32 0.0036580483, %v1058_v44 }
 0x70c   :  { %v1071_v46 = vmul.f32 %v1070_v45, %v1055_v31  ;;  %v1096_v48 = vmul.f32 2.1237322e-06, %v1095_v60  ;;  %v1107_v49 = vmul.f32 3.8918573e-05, %v1095_v60  ;;  %v1060_v57 = vmul.f32 %v1059_v63, %v1055_v31 }
 0x70e   :  { %v1072_v50 = vadd.f32 0.112945676, %v1071_v46  ;;  %v1097_v51 = vadd.f32 0.00028619796, %v1096_v48  ;;  %v1108_v52 = vadd.f32 0.001143296, %v1107_v49 }
 0x70f   :  { %v1061_v2 = vadd.f32 0.05243302, %v1060_v57  ;;  %v1155_v57 = vperm.slane %v1878_v13, 5 }
 0x710   :  { %v1073_v53 = vmul.f32 %v1072_v50, %v1055_v31  ;;  %v1098_v55 = vmul.f32 %v1097_v51, %v1095_v60  ;;  %v1109_v56 = vmul.f32 %v1108_v52, %v1095_v60  ;;  %v1050_v51 = vmul.f32 0.5, %v1996_v24 }
 0x711   :  { %v1062_v7 = vmul.f32 %v1061_v2, %v1055_v31  ;;  %v1051_v52 = vmul.f32 0.5, %v2003_v36 }
 0x712   :  { %v1074_v58 = vadd.f32 0.4994258, %v1073_v53  ;;  %v1099_v59 = vadd.f32 0.0036580483, %v1098_v55  ;;  %v1110_v61 = vadd.f32 0.014752088, %v1109_v56 }
 0x713   :  { %v1063_v28 = vadd.f32 0.18741608, %v1062_v7 }
 0x714   :  { %v1075_v62 = vmul.f32 %v1074_v58, %v1055_v31  ;;  %v1111_v1 = vmul.f32 %v1110_v61, %v1095_v60  ;;  %v1100_v4 = vmul.f32 %v1099_v59, %v1095_v60 }
 0x715   :  { %v1064_v16 = vmul.f32 %v1063_v28, %v1055_v31 }
 0x716   :  { %v1076_v3 = vadd.f32 1.0, %v1075_v62  ;;  %v1112_v5 = vadd.f32 0.112945676, %v1111_v1  ;;  %v1101_v8 = vadd.f32 0.05243302, %v1100_v4 }
 0x717   :  { %v1065_v25 = vadd.f32 1.1283791, %v1064_v16 }
 0x718   :  { %1608 = vrcp.f32 %v1076_v3  ;;  %v1113_v32 = vmul.f32 %v1112_v5, %v1095_v60  ;;  %v1102_v12 = vmul.f32 %v1101_v8, %v1095_v60  ;;  %v1088_v18 = vand.u32 2147483648, %v1076_v3 }
 0x719   :  { %v1086_v22 = vand.u32 2147483647, %v1076_v3  ;;  %vm1082_vm14 = vweird.f32 %v1076_v3  ;;  %v1066_v38 = vmul.f32 %v1065_v25, %v1999_v26 }
 0x71a   :  { %v1114_v9 = vadd.f32 0.4994258, %v1113_v32  ;;  %v1103_v21 = vadd.f32 0.18741608, %v1102_v12  ;;  %v1089_v33 = vor.u32 1.1754944e-38, %v1088_v18 }
 0x71b   :  { %vm1087_vm0 = vcmp.eq.f32.partialorder %v1086_v22, 8.507059e+37 }
 0x71c   :  { %v1115_v10 = vmul.f32 %v1114_v9, %v1095_v60  ;;  %v1104_v34 = vmul.f32 %v1103_v21, %v1095_v60  ;;  %v1616_v21 = vld [vmem:[#allocation12] sm:$0xff] }
 0x71d   :  { %v1264_v22 = vperm.slane %v1616_v21, 6 }
 0x71e   :  { %v1609_v11 = vpop.eup %1608  ;;  %v1116_v14 = vadd.f32 1.0, %v1115_v10  ;;  %v1105_v31 = vadd.f32 1.1283791, %v1104_v34 }
 0x71f   :  { %v1078_v30 = vmul.f32 %v1609_v11, %v1076_v3  ;;  %vm1083_vm13 = vweird.f32 %v1609_v11 }
 0x720   :  { %1610 = vrcp.f32 %v1116_v14  ;;  %vm1084_vm15 = vmor %vm1082_vm14, %vm1083_vm13  ;;  %v1128_v41 = vand.u32 2147483648, %v1116_v14  ;;  %v1126_v44 = vand.u32 2147483647, %v1116_v14  ;;  %vm1122_vm2 = vweird.f32 %v1116_v14 }
 0x721   :  { %v1079_v15 = vsub.f32 1.0, %v1078_v30  ;;  %v1106_v48 = vmul.f32 %v1105_v31, %v2006_v40 }
 0x722   :  { %v1129_v46 = vor.u32 1.1754944e-38, %v1128_v41  ;;  %vm1127_vm4 = vcmp.eq.f32.partialorder %v1126_v44, 8.507059e+37 }
 0x723   :  { %v1080_v17 = vmul.f32 %v1609_v11, %v1079_v15 }
 0x725   :  { %v1081_v23 = vadd.f32 %v1609_v11, %v1080_v17 }
 0x726   :  { %v1611_v27 = vpop.eup %1610 }
 0x727   :  { %v1085_v29 = vsel %vm1084_vm15, %v1609_v11, %v1081_v23  ;;  %v1118_v35 = vmul.f32 %v1611_v27, %v1116_v14  ;;  %vm1123_vm1 = vweird.f32 %v1611_v27 }
 0x728   :  { %v1090_v37 = vsel %vm1087_vm0, %v1089_v33, %v1085_v29  ;;  %vm1124_vm3 = vmor %vm1122_vm2, %vm1123_vm1  ;;  %v1267_v29 = vperm.slane %v1616_v21, 7 }
 0x729   :  { %v1119_v39 = vsub.f32 1.0, %v1118_v35  ;;  %v1091_v42 = vmul.f32 %v1090_v37, %v1066_v38 }
 0x72b   :  { %v1120_v43 = vmul.f32 %v1611_v27, %v1119_v39  ;;  %v1474_v47 = vclamps-f32 %v1091_v42, 1.0 }
 0x72d   :  { %v1121_v45 = vadd.f32 %v1611_v27, %v1120_v43  ;;  %v1134_v50 = vadd.f32 1.0, %v1474_v47 }
 0x72f   :  { %v1125_v60 = vsel %vm1124_vm3, %v1611_v27, %v1121_v45  ;;  %v1136_v54 = vmul.f32 %v1134_v50, %v1050_v51 }
 0x730   :  { %v1130_v49 = vsel %vm1127_vm4, %v1129_v46, %v1125_v60 }
 0x731   :  { %v1131_v63 = vmul.f32 %v1130_v49, %v1106_v48 }
 0x733   :  { %v1475_v26 = vclamps-f32 %v1131_v63, 1.0 }
 0x735   :  { %v1135_v53 = vadd.f32 1.0, %v1475_v26 }
 0x737   :  { %v1137_v55 = vmul.f32 %v1135_v53, %v1051_v52 }
 0x739   :  { %v1138_v56 = vpack.c.bf16 %v1137_v55, %v1136_v54 }
 0x73b   :  { %1212 = vmatmul.bf16.vlgmr.msrb.gmra.mxu3 %v1138_v56 }
 0x7be   :  { %v1213_v58 = vpop.f32.mrf.mxu3 }
 0x7bf   :  { %v1214_v59 = vadd.f32 %v1213_v58, %v1155_v57 }
 0x7c1   :  { %v1218_v40 = vadd.f32 %v1214_v59, %v1989_v19 }
 0x7c3   :  { %1220 = vadd.xlane.f32.xlu0 %v1218_v40  ;;  %v1226_v61 = vmul.f32 %v1218_v40, %v1218_v40 }
 0x7c5   :  { %1228 = vadd.xlane.f32.xlu1 %v1226_v61 }
 0x7c6   :  { %v1215_v62 = vpop.f32.mrf.mxu3 }
 0x7c7   :  { %v1216_v0 = vadd.f32 %v1215_v62, %v1155_v57 }
 0x7c9   :  { %v1219_v24 = vadd.f32 %v1216_v0, %v1991_v20 }
 0x7cb   :  { %1222 = vadd.xlane.f32.xlu2 %v1219_v24  ;;  %v1227_v36 = vmul.f32 %v1219_v24, %v1219_v24 }
 0x7cd   :  { %1230 = vadd.xlane.f32.xlu0 %v1227_v36 }
 0x836   :  { %v1221_v1 = vpop.xlane.xlu0 %1220 }
 0x837   :  { %v1224_v2 = vmul.f32 0.03125, %v1221_v1 }
 0x838   :  { %v1229_v3 = vpop.xlane.xlu1 %1228 }
 0x839   :  { %v1234_v4 = vmul.f32 %v1224_v2, %v1224_v2  ;;  %v1232_v5 = vmul.f32 0.03125, %v1229_v3  ;;  %v1238_v18 = vsub.f32 %v1218_v40, %v1224_v2 }
 0x83b   :  { %v1236_v13 = vsub.f32 %v1232_v5, %v1234_v4 }
 0x83d   :  { %v1240_v6 = vadd.f32 1e-05, %v1236_v13 }
 0x83e   :  { %v1223_v32 = vpop.xlane.xlu2 %1222 }
 0x83f   :  { %1612 = vrsqrt.f32 %v1240_v6  ;;  %v1225_v19 = vmul.f32 0.03125, %v1223_v32  ;;  %vm1248_vm6 = vweird.f32 %v1240_v6 }
 0x840   :  { %v1231_v7 = vpop.xlane.xlu0 %1230 }
 0x841   :  { %v1235_v8 = vmul.f32 %v1225_v19, %v1225_v19  ;;  %v1233_v9 = vmul.f32 0.03125, %v1231_v7  ;;  %v1239_v39 = vsub.f32 %v1219_v24, %v1225_v19 }
 0x843   :  { %v1237_v10 = vsub.f32 %v1233_v9, %v1235_v8 }
 0x845   :  { %v1613_v11 = vpop.eup %1612  ;;  %v1241_v28 = vadd.f32 1e-05, %v1237_v10 }
 0x846   :  { %v1243_v20 = vmul.f32 %v1613_v11, %v1240_v6  ;;  %vm1249_vm5 = vweird.f32 %v1613_v11 }
 0x847   :  { %1614 = vrsqrt.f32 %v1241_v28  ;;  %vm1250_vm7 = vmor %vm1248_vm6, %vm1249_vm5  ;;  %vm1258_vm9 = vweird.f32 %v1241_v28 }
 0x848   :  { %v1244_v30 = vmul.f32 %v1613_v11, %v1243_v20 }
 0x84a   :  { %v1245_v12 = vmul.f32 0.5, %v1244_v30 }
 0x84c   :  { %v1246_v14 = vsub.f32 1.5, %v1245_v12 }
 0x84d   :  { %v1615_v15 = vpop.eup %1614 }
 0x84e   :  { %v1247_v16 = vmul.f32 %v1613_v11, %v1246_v14  ;;  %v1253_v17 = vmul.f32 %v1615_v15, %v1241_v28  ;;  %vm1259_vm8 = vweird.f32 %v1615_v15 }
 0x84f   :  { %vm1260_vm10 = vmor %vm1258_vm9, %vm1259_vm8 }
 0x850   :  { %v1251_v23 = vsel %vm1250_vm7, %v1613_v11, %v1247_v16  ;;  %v1254_v25 = vmul.f32 %v1615_v15, %v1253_v17 }
 0x851   :  { %v1262_v27 = vmul.f32 %v1251_v23, %v1238_v18 }
 0x852   :  { %v1255_v33 = vmul.f32 0.5, %v1254_v25 }
 0x853   :  { %v1265_v34 = vmul.f32 %v1264_v22, %v1262_v27 }
 0x854   :  { %v1256_v35 = vsub.f32 1.5, %v1255_v33 }
 0x855   :  { %v1268_v37 = vadd.f32 %v1267_v29, %v1265_v34 }
 0x856   :  { %v1257_v38 = vmul.f32 %v1615_v15, %v1256_v35 }
 0x857   :  { %1270 = vst [vmem:[#allocation14] sm:$0xff] %v1268_v37 }
 0x858   :  { %v1261_v31 = vsel %vm1260_vm10, %v1615_v15, %v1257_v38 }
 0x859   :  { %v1263_v41 = vmul.f32 %v1261_v31, %v1239_v39 }
 0x85b   :  { %v1266_v42 = vmul.f32 %v1264_v22, %v1263_v41 }
 0x85d   :  { %v1269_v43 = vadd.f32 %v1267_v29, %v1266_v42 }
 0x85f   :  { %1271 = vst [vmem:[#allocation14 + $0x8] sm:$0xff] %v1269_v43 }
 0x860   :  { %1284 = dma.vmem_to_hbm [thread:$0]  %s1277_s30, 256, %s1279_s9, [#allocation5], %s1802_s17, %s1802_s17, %s1803_s18  }
 0x861   :  { %1793 = dma.done.wait [#allocation5], 256  }
 0x862   :  { %1794 = vsyncadd [#allocation5], 4294967040 }
 0x863   :  { %1289 = vsyncpa [#allocation4], 1 }
 0x864   :  { %1290 = vsyncpa [#allocation7], 1 }
 0x865   :  { %1291 = vsyncpa [#allocation10], 1 }
 0x866   :  { %1292 = vsyncpa [#allocation13], 1 }
 0x867   :  { %1293 = vsyncpa [#allocation5], 1 }

</bundles_post_ra>
